<compile_context>
chip_gen: v6e
topology: v6e:2x2x1
jax: 0.10.0
libtpu: 0.0.40
codegen_flags: <defaults>
</compile_context>

<pallas_src>
import functools

import jax
import jax.numpy as jnp
from jax.experimental import pallas as pl
from jax.experimental.pallas import tpu as pltpu

M_POINTS = 2025          # 45 x 45 plane grid (hardcoded in the module)
TN = 1024                # points per grid step (lane axis)
M_PAD = 2048             # M_POINTS padded up to a multiple of TN


def _foldnet_kernel(pts_ref, c1_ref, c2_ref,
                    a1g_ref, w1b_ref, w12_ref, w2b_ref, w2c_ref,
                    b1b_ref, b2b_ref, b2c_ref,
                    out_ref):
    g = pts_ref[...]                     # (2, TN) plane-grid tile, channel-major
    c1 = c1_ref[0]                       # (F, 1)  per-batch const: W1a_feat @ feat + b1a
    c2 = c2_ref[0]                       # (F, 1)  per-batch const for the fused layer

    # folding1 layer 1 (grid part only; codeword part hoisted into c1)
    h = jnp.dot(a1g_ref[...], g, preferred_element_type=jnp.float32) + c1      # (F, TN)
    h = jnp.maximum(h, 0.0)
    # folding1 layer 2
    h = jnp.dot(w1b_ref[...], h, preferred_element_type=jnp.float32) + b1b_ref[...]
    h = jnp.maximum(h, 0.0)
    # folding1 layer 3 fused with folding2 layer 1 (no ReLU between them)
    h = jnp.dot(w12_ref[...], h, preferred_element_type=jnp.float32) + c2
    h = jnp.maximum(h, 0.0)
    # folding2 layer 2
    h = jnp.dot(w2b_ref[...], h, preferred_element_type=jnp.float32) + b2b_ref[...]
    h = jnp.maximum(h, 0.0)
    # folding2 layer 3 -> lane-dense (3, TN) store
    out_ref[0] = jnp.dot(w2c_ref[...], h, preferred_element_type=jnp.float32) + b2c_ref[...]


def build_plane_grid():
    x = jnp.linspace(-0.3, 0.3, 45)
    y = jnp.linspace(-0.3, 0.3, 45)
    # itertools.product(x, y): x varies slowest, y fastest
    pts = jnp.stack([jnp.repeat(x, 45), jnp.tile(y, 45)], axis=1)   # (2025, 2)
    return pts.astype(jnp.float32)


def init_params(key, feat_dims):
    """Deterministic init mimicking PyTorch Conv1d default (uniform +-1/sqrt(fan_in))."""
    F = feat_dims
    shapes = [  # (out, in) per conv layer
        (F, F + 2), (F, F), (3, F),       # folding1
        (F, F + 3), (F, F), (3, F),       # folding2
    ]
    params = []
    keys = jax.random.split(key, 2 * len(shapes))
    for i, (co, ci) in enumerate(shapes):
        bound = 1.0 / jnp.sqrt(ci)
        w = jax.random.uniform(keys[2 * i], (co, ci), jnp.float32, -bound, bound)
        b = jax.random.uniform(keys[2 * i + 1], (co,), jnp.float32, -bound, bound)
        params.append((w, b))
    return params


@functools.partial(jax.jit, static_argnames=("feat_dims",))
def foldnet_decoder_forward(x, params, feat_dims):
    """x: (B, 1, feat_dims) float32 -> (B, 2025, 3) float32."""
    B = x.shape[0]
    F = feat_dims
    feat = x.reshape(B, F).astype(jnp.float32)                        # (B, F) codewords

    pts = build_plane_grid()                                          # (2025, 2)
    pts_cm = jnp.zeros((2, M_PAD), jnp.float32).at[:, :M_POINTS].set(pts.T)

    (W1a, b1a), (W1b, b1b), (W1c, b1c), (W2a, b2a), (W2b, b2b), (W2c, b2c) = params
    hp = jax.lax.Precision.HIGHEST

    # split first-layer weights: channel order in cat is [feat..., extra...]
    W1a_f, W1a_g = W1a[:, :F], W1a[:, F:]          # (F, F), (F, 2)
    W2a_f, W2a_x = W2a[:, :F], W2a[:, F:]          # (F, F), (F, 3)

    # hoisted per-batch constants (depend on the codeword only, not on the point index)
    c1 = (jnp.dot(feat, W1a_f.T, precision=hp) + b1a).reshape(B, F, 1)
    c2 = (jnp.dot(feat, W2a_f.T, precision=hp) + b2a
          + jnp.dot(W2a_x, b1c, precision=hp)).reshape(B, F, 1)
    # fused folding1-last-conv / folding2-first-conv weight
    W12 = jnp.dot(W2a_x, W1c, precision=hp)                           # (F, F)

    col = lambda v: v.reshape(-1, 1)
    n_tiles = M_PAD // TN
    const = lambda shp: pl.BlockSpec(shp, lambda b, n: (0,) * len(shp))

    out_cm = pl.pallas_call(
        _foldnet_kernel,
        out_shape=jax.ShapeDtypeStruct((B, 3, M_PAD), jnp.float32),
        grid_spec=pltpu.PrefetchScalarGridSpec(
            num_scalar_prefetch=0,
            grid=(B, n_tiles),
            in_specs=[
                pl.BlockSpec((2, TN), lambda b, n: (0, n)),           # plane-grid tile
                pl.BlockSpec((1, F, 1), lambda b, n: (b, 0, 0)),      # c1 (per batch)
                pl.BlockSpec((1, F, 1), lambda b, n: (b, 0, 0)),      # c2 (per batch)
                const((F, 2)),                                        # W1a grid part
                const((F, F)), const((F, F)), const((F, F)),          # W1b, W12, W2b
                const((3, F)),                                        # W2c
                const((F, 1)), const((F, 1)), const((3, 1)),          # b1b, b2b, b2c
            ],
            out_specs=pl.BlockSpec((1, 3, TN), lambda b, n: (b, 0, n)),
        ),
        compiler_params=pltpu.CompilerParams(
            dimension_semantics=("parallel", "parallel")),
    )(pts_cm, c1, c2,
      W1a_g, W1b, W12, W2b, W2c,
      col(b1b), col(b2b), col(b2c))

    # drop the padded points and return in the PyTorch output layout (B, m, 3)
    return jnp.transpose(out_cm[:, :, :M_POINTS], (0, 2, 1))


def foldnet_decoder_reference(x, params, feat_dims):
    """Pure-JAX reference matching the PyTorch forward exactly (NCW conv1d, k=1)."""
    B = x.shape[0]
    feat = jnp.repeat(jnp.transpose(x, (0, 2, 1)), M_POINTS, axis=2)      # (B, F, m)
    pts = jnp.broadcast_to(build_plane_grid().T[None], (B, 2, M_POINTS))  # (B, 2, m)

    def conv1(h, W, b):  # W: (out, in)
        return jnp.einsum('oi,bim->bom', W, h) + b[None, :, None]

    (W1a, b1a), (W1b, b1b), (W1c, b1c), (W2a, b2a), (W2b, b2b), (W2c, b2c) = params
    cat1 = jnp.concatenate([feat, pts], axis=1)
    h = jax.nn.relu(conv1(cat1, W1a, b1a))
    h = jax.nn.relu(conv1(h, W1b, b1b))
    f1 = conv1(h, W1c, b1c)
    cat2 = jnp.concatenate([feat, f1], axis=1)
    h = jax.nn.relu(conv1(cat2, W2a, b2a))
    h = jax.nn.relu(conv1(h, W2b, b2b))
    f2 = conv1(h, W2c, b2c)
    return jnp.transpose(f2, (0, 2, 1))                                   # (B, m, 3)


# TODO(synk): shape='sphere'/'gaussian' load sphere.npy / gaussian.npy from disk; only the
# 'plane' branch (the 45x45 meshgrid) is implemented in-script.

if __name__ == "__main__":
    B = 2
    FEAT_DIMS = 32

    key = jax.random.PRNGKey(0)
    k_x, k_p = jax.random.split(key)
    x = jax.random.normal(k_x, (B, 1, FEAT_DIMS), jnp.float32)   # encoder codeword
    params = init_params(k_p, FEAT_DIMS)

    out = foldnet_decoder_forward(x, params, FEAT_DIMS)
    out = jax.block_until_ready(out)
    assert out.shape == (B, M_POINTS, 3), out.shape

    ref = jax.block_until_ready(foldnet_decoder_reference(x, params, FEAT_DIMS))
    err = float(jnp.max(jnp.abs(out - ref)))
    assert err < 1e-3, f"max abs error {err}"

    print("KERNEL_OK")
</pallas_src>

<mosaic_0001>
module attributes {stable_mosaic.version = 11 : i64} {
  func.func @_foldnet_kernel(%arg0: i32, %arg1: i32, %arg2: memref<2x1024xf32, #tpu.memory_space<vmem>>, %arg3: memref<1x32x1xf32, #tpu.memory_space<vmem>>, %arg4: memref<1x32x1xf32, #tpu.memory_space<vmem>>, %arg5: memref<32x2xf32, #tpu.memory_space<vmem>>, %arg6: memref<32x32xf32, #tpu.memory_space<vmem>>, %arg7: memref<32x32xf32, #tpu.memory_space<vmem>>, %arg8: memref<32x32xf32, #tpu.memory_space<vmem>>, %arg9: memref<3x32xf32, #tpu.memory_space<vmem>>, %arg10: memref<32x1xf32, #tpu.memory_space<vmem>>, %arg11: memref<32x1xf32, #tpu.memory_space<vmem>>, %arg12: memref<3x1xf32, #tpu.memory_space<vmem>>, %arg13: memref<1x3x1024xf32, #tpu.memory_space<vmem>>) attributes {dimension_semantics = [#tpu.dimension_semantics<parallel>, #tpu.dimension_semantics<parallel>], iteration_bounds = array<i64: 2, 2>, scalar_prefetch = 0 : i64, scratch_operands = 0 : i64, tpu.core_type = #tpu.core_type<tc>, window_params = [{transform_indices = @transform_0, window_bounds = array<i64: 2, 1024>}, {transform_indices = @transform_1, window_bounds = array<i64: 1, 32, 1>}, {transform_indices = @transform_2, window_bounds = array<i64: 1, 32, 1>}, {pipeline_mode = #tpu.pipeline_mode<synchronous>, transform_indices = @transform_3, window_bounds = array<i64: 32, 2>}, {pipeline_mode = #tpu.pipeline_mode<synchronous>, transform_indices = @transform_4, window_bounds = array<i64: 32, 32>}, {pipeline_mode = #tpu.pipeline_mode<synchronous>, transform_indices = @transform_5, window_bounds = array<i64: 32, 32>}, {pipeline_mode = #tpu.pipeline_mode<synchronous>, transform_indices = @transform_6, window_bounds = array<i64: 32, 32>}, {pipeline_mode = #tpu.pipeline_mode<synchronous>, transform_indices = @transform_7, window_bounds = array<i64: 3, 32>}, {pipeline_mode = #tpu.pipeline_mode<synchronous>, transform_indices = @transform_8, window_bounds = array<i64: 32, 1>}, {pipeline_mode = #tpu.pipeline_mode<synchronous>, transform_indices = @transform_9, window_bounds = array<i64: 32, 1>}, {pipeline_mode = #tpu.pipeline_mode<synchronous>, transform_indices = @transform_10, window_bounds = array<i64: 3, 1>}, {transform_indices = @transform_11, window_bounds = array<i64: 1, 3, 1024>}]} {
    %c0 = arith.constant 0 : index
    %c0_0 = arith.constant 0 : index
    %0 = vector.load %arg2[%c0, %c0_0] : memref<2x1024xf32, #tpu.memory_space<vmem>>, vector<2x1024xf32>
    %c0_1 = arith.constant 0 : index
    %c0_2 = arith.constant 0 : index
    %c0_3 = arith.constant 0 : index
    %1 = vector.load %arg3[%c0_1, %c0_2, %c0_3] : memref<1x32x1xf32, #tpu.memory_space<vmem>>, vector<1x32x1xf32>
    %2 = vector.shape_cast %1 : vector<1x32x1xf32> to vector<32x1xf32>
    %c0_4 = arith.constant 0 : index
    %c0_5 = arith.constant 0 : index
    %c0_6 = arith.constant 0 : index
    %3 = vector.load %arg4[%c0_4, %c0_5, %c0_6] : memref<1x32x1xf32, #tpu.memory_space<vmem>>, vector<1x32x1xf32>
    %4 = vector.shape_cast %3 : vector<1x32x1xf32> to vector<32x1xf32>
    %c0_7 = arith.constant 0 : index
    %c0_8 = arith.constant 0 : index
    %5 = vector.load %arg5[%c0_7, %c0_8] : memref<32x2xf32, #tpu.memory_space<vmem>>, vector<32x2xf32>
    %cst = arith.constant dense<0.000000e+00> : vector<32x1024xf32>
    %6 = tpu.matmul %5, %0, %cst {dimension_numbers = #tpu.dot_dimension_numbers<[1], [0], [0], [1], [0, 0, 1, 1], [], []>} : vector<32x2xf32>, vector<2x1024xf32>, vector<32x1024xf32> -> vector<32x1024xf32>
    %7 = vector.broadcast %2 : vector<32x1xf32> to vector<32x1024xf32>
    %8 = arith.addf %6, %7 : vector<32x1024xf32>
    %cst_9 = arith.constant 0.000000e+00 : f32
    %9 = vector.broadcast %cst_9 : f32 to vector<32x1024xf32>
    %10 = arith.maximumf %8, %9 : vector<32x1024xf32>
    %c0_10 = arith.constant 0 : index
    %c0_11 = arith.constant 0 : index
    %11 = vector.load %arg6[%c0_10, %c0_11] : memref<32x32xf32, #tpu.memory_space<vmem>>, vector<32x32xf32>
    %cst_12 = arith.constant dense<0.000000e+00> : vector<32x1024xf32>
    %12 = tpu.matmul %11, %10, %cst_12 {dimension_numbers = #tpu.dot_dimension_numbers<[1], [0], [0], [1], [0, 0, 1, 1], [], []>} : vector<32x32xf32>, vector<32x1024xf32>, vector<32x1024xf32> -> vector<32x1024xf32>
    %c0_13 = arith.constant 0 : index
    %c0_14 = arith.constant 0 : index
    %13 = vector.load %arg10[%c0_13, %c0_14] : memref<32x1xf32, #tpu.memory_space<vmem>>, vector<32x1xf32>
    %14 = vector.broadcast %13 : vector<32x1xf32> to vector<32x1024xf32>
    %15 = arith.addf %12, %14 : vector<32x1024xf32>
    %cst_15 = arith.constant 0.000000e+00 : f32
    %16 = vector.broadcast %cst_15 : f32 to vector<32x1024xf32>
    %17 = arith.maximumf %15, %16 : vector<32x1024xf32>
    %c0_16 = arith.constant 0 : index
    %c0_17 = arith.constant 0 : index
    %18 = vector.load %arg7[%c0_16, %c0_17] : memref<32x32xf32, #tpu.memory_space<vmem>>, vector<32x32xf32>
    %cst_18 = arith.constant dense<0.000000e+00> : vector<32x1024xf32>
    %19 = tpu.matmul %18, %17, %cst_18 {dimension_numbers = #tpu.dot_dimension_numbers<[1], [0], [0], [1], [0, 0, 1, 1], [], []>} : vector<32x32xf32>, vector<32x1024xf32>, vector<32x1024xf32> -> vector<32x1024xf32>
    %20 = vector.broadcast %4 : vector<32x1xf32> to vector<32x1024xf32>
    %21 = arith.addf %19, %20 : vector<32x1024xf32>
    %cst_19 = arith.constant 0.000000e+00 : f32
    %22 = vector.broadcast %cst_19 : f32 to vector<32x1024xf32>
    %23 = arith.maximumf %21, %22 : vector<32x1024xf32>
    %c0_20 = arith.constant 0 : index
    %c0_21 = arith.constant 0 : index
    %24 = vector.load %arg8[%c0_20, %c0_21] : memref<32x32xf32, #tpu.memory_space<vmem>>, vector<32x32xf32>
    %cst_22 = arith.constant dense<0.000000e+00> : vector<32x1024xf32>
    %25 = tpu.matmul %24, %23, %cst_22 {dimension_numbers = #tpu.dot_dimension_numbers<[1], [0], [0], [1], [0, 0, 1, 1], [], []>} : vector<32x32xf32>, vector<32x1024xf32>, vector<32x1024xf32> -> vector<32x1024xf32>
    %c0_23 = arith.constant 0 : index
    %c0_24 = arith.constant 0 : index
    %26 = vector.load %arg11[%c0_23, %c0_24] : memref<32x1xf32, #tpu.memory_space<vmem>>, vector<32x1xf32>
    %27 = vector.broadcast %26 : vector<32x1xf32> to vector<32x1024xf32>
    %28 = arith.addf %25, %27 : vector<32x1024xf32>
    %cst_25 = arith.constant 0.000000e+00 : f32
    %29 = vector.broadcast %cst_25 : f32 to vector<32x1024xf32>
    %30 = arith.maximumf %28, %29 : vector<32x1024xf32>
    %c0_26 = arith.constant 0 : index
    %c0_27 = arith.constant 0 : index
    %31 = vector.load %arg9[%c0_26, %c0_27] : memref<3x32xf32, #tpu.memory_space<vmem>>, vector<3x32xf32>
    %cst_28 = arith.constant dense<0.000000e+00> : vector<3x1024xf32>
    %32 = tpu.matmul %31, %30, %cst_28 {dimension_numbers = #tpu.dot_dimension_numbers<[1], [0], [0], [1], [0, 0, 1, 1], [], []>} : vector<3x32xf32>, vector<32x1024xf32>, vector<3x1024xf32> -> vector<3x1024xf32>
    %c0_29 = arith.constant 0 : index
    %c0_30 = arith.constant 0 : index
    %33 = vector.load %arg12[%c0_29, %c0_30] : memref<3x1xf32, #tpu.memory_space<vmem>>, vector<3x1xf32>
    %34 = vector.broadcast %33 : vector<3x1xf32> to vector<3x1024xf32>
    %35 = arith.addf %32, %34 : vector<3x1024xf32>
    %c0_31 = arith.constant 0 : index
    %c0_32 = arith.constant 0 : index
    %c0_33 = arith.constant 0 : index
    %36 = vector.load %arg13[%c0_31, %c0_32, %c0_33] : memref<1x3x1024xf32, #tpu.memory_space<vmem>>, vector<1x3x1024xf32>
    %37 = vector.shape_cast %36 : vector<1x3x1024xf32> to vector<3x1024xf32>
    %38 = vector.shape_cast %35 : vector<3x1024xf32> to vector<1x3x1024xf32>
    tpu.vector_store %arg13[%c0_31, %c0_32, %c0_33], %38 {strides = array<i32>} : memref<1x3x1024xf32, #tpu.memory_space<vmem>>, vector<1x3x1024xf32>,
    return
  }
  func.func @transform_0(%arg0: i32, %arg1: i32) -> (i32, i32) {
    %c0_i32 = arith.constant 0 : i32
    %c0_i32_0 = arith.constant 0 : i32
    return %c0_i32, %arg1 : i32, i32
  }
  func.func @transform_1(%arg0: i32, %arg1: i32) -> (i32, i32, i32) {
    %c0_i32 = arith.constant 0 : i32
    %c0_i32_0 = arith.constant 0 : i32
    %c0_i32_1 = arith.constant 0 : i32
    return %arg0, %c0_i32, %c0_i32_0 : i32, i32, i32
  }
  func.func @transform_2(%arg0: i32, %arg1: i32) -> (i32, i32, i32) {
    %c0_i32 = arith.constant 0 : i32
    %c0_i32_0 = arith.constant 0 : i32
    %c0_i32_1 = arith.constant 0 : i32
    return %arg0, %c0_i32, %c0_i32_0 : i32, i32, i32
  }
  func.func @transform_3(%arg0: i32, %arg1: i32) -> (i32, i32) {
    %c0_i32 = arith.constant 0 : i32
    %c0_i32_0 = arith.constant 0 : i32
    %c0_i32_1 = arith.constant 0 : i32
    return %c0_i32, %c0_i32_0 : i32, i32
  }
  func.func @transform_4(%arg0: i32, %arg1: i32) -> (i32, i32) {
    %c0_i32 = arith.constant 0 : i32
    %c0_i32_0 = arith.constant 0 : i32
    %c0_i32_1 = arith.constant 0 : i32
    return %c0_i32, %c0_i32_0 : i32, i32
  }
  func.func @transform_5(%arg0: i32, %arg1: i32) -> (i32, i32) {
    %c0_i32 = arith.constant 0 : i32
    %c0_i32_0 = arith.constant 0 : i32
    %c0_i32_1 = arith.constant 0 : i32
    return %c0_i32, %c0_i32_0 : i32, i32
  }
  func.func @transform_6(%arg0: i32, %arg1: i32) -> (i32, i32) {
    %c0_i32 = arith.constant 0 : i32
    %c0_i32_0 = arith.constant 0 : i32
    %c0_i32_1 = arith.constant 0 : i32
    return %c0_i32, %c0_i32_0 : i32, i32
  }
  func.func @transform_7(%arg0: i32, %arg1: i32) -> (i32, i32) {
    %c0_i32 = arith.constant 0 : i32
    %c0_i32_0 = arith.constant 0 : i32
    %c0_i32_1 = arith.constant 0 : i32
    return %c0_i32, %c0_i32_0 : i32, i32
  }
  func.func @transform_8(%arg0: i32, %arg1: i32) -> (i32, i32) {
    %c0_i32 = arith.constant 0 : i32
    %c0_i32_0 = arith.constant 0 : i32
    %c0_i32_1 = arith.constant 0 : i32
    return %c0_i32, %c0_i32_0 : i32, i32
  }
  func.func @transform_9(%arg0: i32, %arg1: i32) -> (i32, i32) {
    %c0_i32 = arith.constant 0 : i32
    %c0_i32_0 = arith.constant 0 : i32
    %c0_i32_1 = arith.constant 0 : i32
    return %c0_i32, %c0_i32_0 : i32, i32
  }
  func.func @transform_10(%arg0: i32, %arg1: i32) -> (i32, i32) {
    %c0_i32 = arith.constant 0 : i32
    %c0_i32_0 = arith.constant 0 : i32
    %c0_i32_1 = arith.constant 0 : i32
    return %c0_i32, %c0_i32_0 : i32, i32
  }
  func.func @transform_11(%arg0: i32, %arg1: i32) -> (i32, i32, i32) {
    %c0_i32 = arith.constant 0 : i32
    %c0_i32_0 = arith.constant 0 : i32
    return %arg0, %c0_i32, %arg1 : i32, i32, i32
  }
}

</mosaic_0001>

<bundles_post_ra>
// kernel: tile.8
= control target key start
LH: loop header
LB: loop body
LE: loop exit
PB: predicated region body
PF: predicated region fallthrough
CT: control target
= control target key end

     0   :  { %s52_s0 = inlined_call_operand.vmem [shape: f32[45], index: 0, kind: input, shape index: {}]   ;;  %s53_s1 = inlined_call_operand.vmem [shape: f32[45,45], index: 1, kind: output, shape index: {}]  }
   0x1   :  { %v4_v0 = vld [vmem:[%s52_s0] ss:$0 sm:$0xff] }
   0x2   :  { %5 = vst [vmem:[%s53_s1] sm:$0xff] %v4_v0  ;;  %16 = vst [vmem:[%s53_s1 + $0x8] sm:$0xff] %v4_v0 }
   0x3   :  { %17 = vst [vmem:[%s53_s1 + $0x10] sm:$0xff] %v4_v0  ;;  %18 = vst [vmem:[%s53_s1 + $0x18] sm:$0xff] %v4_v0 }
   0x4   :  { %19 = vst [vmem:[%s53_s1 + $0x20] sm:$0xff] %v4_v0  ;;  %20 = vst [vmem:[%s53_s1 + $0x28] sm:$0xff] %v4_v0 }

// kernel: tile.9
= control target key start
LH: loop header
LB: loop body
LE: loop exit
PB: predicated region body
PF: predicated region fallthrough
CT: control target
= control target key end

     0   :  { %vm37_vm0 = vcmask 80896   ;;  %vm9_vm1 = vcmask 23552   ;;  %s660_s14 = smov 118   ;;  %vm51_vm2 = vcmask 105472   ;;  %s661_s19 = smov 125   ;;  %vm23_vm3 = vcmask 48128   ;;  %s942_s0 = inlined_call_operand.vmem [shape: f32[45,45], index: 0, kind: input, shape index: {}]   ;;  %s943_s1 = inlined_call_operand.vmem [shape: f32[2025,1], index: 1, kind: output, shape index: {}]  }
   0x1   :  { %v546_v0 = vld [vmem:[%s942_s0 + $0xe] sm:$0x1]   ;;  %v542_v3 = vld [vmem:[%s942_s0 + $0x11] sm:$0x1]   ;;  %v548_v6 = vld [vmem:[%s942_s0 + $0x1f] sm:$0x1]  }
   0x2   :  { %v547_v1 = vld [vmem:[%s942_s0 + $0xe] sm:$0x1]   ;;  %v543_v4 = vld [vmem:[%s942_s0 + $0x11] sm:$0x1]   ;;  %v549_v7 = vld [vmem:[%s942_s0 + $0x1f] sm:$0x1]  }
   0x3   :  { %v38_v2 = vsel %vm37_vm0, %v547_v1, %v546_v0  ;;  %v10_v5 = vsel %vm9_vm1, %v543_v4, %v542_v3  ;;  %v52_v8 = vsel %vm51_vm2, %v549_v7, %v548_v6  ;;  %v544_v9 = vld [vmem:[%s942_s0 + $0x22] sm:$0x1]   ;;  %v552_v12 = vld [vmem:[%s942_s0 + $0x1c] sm:$0x1]   ;;  %vm79_vm4 = vcmask 162816   ;;  %s662_s3 = smov 115  }
   0x4   :  { %39 = vrot.lane.b32.xlu1 %v38_v2, %s660_s14  ;;  %11 = vrot.lane.b32.xlu0 %v10_v5, %s661_s19  ;;  %v545_v10 = vld [vmem:[%s942_s0 + $0x22] sm:$0x1]   ;;  %v553_v13 = vld [vmem:[%s942_s0 + $0x1c] sm:$0x1]   ;;  %vm65_vm5 = vcmask 138240   ;;  %s663_s4 = smov 122  }
   0x5   :  { %v24_v11 = vsel %vm23_vm3, %v545_v10, %v544_v9  ;;  %v550_v14 = vld [vmem:[%s942_s0 + $0xb] sm:$0x1]   ;;  %v80_v16 = vsel %vm79_vm4, %v553_v13, %v552_v12  ;;  %v556_v18 = vld [vmem:[%s942_s0 + $0x19] sm:$0x1]   ;;  %vm107_vm6 = vcmask 220160   ;;  %vm93_vm7 = vcmask 195584  }
   0x6   :  { %v551_v15 = vld [vmem:[%s942_s0 + $0xb] sm:$0x1]   ;;  %v557_v19 = vld [vmem:[%s942_s0 + $0x19] sm:$0x1]   ;;  %v554_v20 = vld [vmem:[%s942_s0 + $0x8] sm:$0x1]  }
   0x7   :  { %v66_v17 = vsel %vm65_vm5, %v551_v15, %v550_v14  ;;  %v555_v21 = vld [vmem:[%s942_s0 + $0x8] sm:$0x1]   ;;  %s664_s13 = smov 108   ;;  %s665_s14 = smov 111   ;;  %v108_v22 = vsel %vm107_vm6, %v557_v19, %v556_v18  ;;  %v560_v24 = vld [vmem:[%s942_s0 + $0x5] sm:$0x1]  }
   0x8   :  { %53 = vrot.lane.b32.xlu1 %v52_v8, %s662_s3  ;;  %25 = vrot.lane.b32.xlu0 %v24_v11, %s663_s4  ;;  %v94_v23 = vsel %vm93_vm7, %v555_v21, %v554_v20  ;;  %v561_v25 = vld [vmem:[%s942_s0 + $0x5] sm:$0x1]   ;;  %vm135_vm8 = vcmask 252928   ;;  %v558_v26 = vld [vmem:[%s942_s0 + $0x2a] sm:$0x1]   ;;  %vm121_vm9 = vcmask 244736  }
   0x9   :  { %v559_v27 = vld [vmem:[%s942_s0 + $0x2a] sm:$0x1]   ;;  %s666_s23 = smov 101   ;;  %s667_s24 = smov 104   ;;  %v136_v28 = vsel %vm135_vm8, %v561_v25, %v560_v24  ;;  %v564_v30 = vld [vmem:[%s942_s0 + $0x27] sm:$0x1]  }
   0xa   :  { %v122_v29 = vsel %vm121_vm9, %v559_v27, %v558_v26  ;;  %v565_v31 = vld [vmem:[%s942_s0 + $0x27] sm:$0x1]   ;;  %vm163_vm10 = vcmask 302080   ;;  %v562_v32 = vld [vmem:[%s942_s0 + $0x16] sm:$0x1]   ;;  %vm149_vm11 = vcmask 277504  }
   0xb   :  { %v563_v33 = vld [vmem:[%s942_s0 + $0x16] sm:$0x1]   ;;  %s668_s4 = smov 97   ;;  %s669_s5 = smov 98   ;;  %v164_v34 = vsel %vm163_vm10, %v565_v31, %v564_v30  ;;  %v568_v36 = vld [vmem:[%s942_s0 + $0x13] sm:$0x1]  }
   0xc   :  { %81 = vrot.lane.b32.xlu1 %v80_v16, %s664_s13  ;;  %67 = vrot.lane.b32.xlu0 %v66_v17, %s665_s14  ;;  %v150_v35 = vsel %vm149_vm11, %v563_v33, %v562_v32  ;;  %v569_v37 = vld [vmem:[%s942_s0 + $0x13] sm:$0x1]   ;;  %vm190_vm12 = vcmask 334848   ;;  %v566_v38 = vld [vmem:[%s942_s0 + $0x2] sm:$0x1]   ;;  %vm177_vm13 = vcmask 310272  }
   0xd   :  { %v567_v39 = vld [vmem:[%s942_s0 + $0x2] sm:$0x1]   ;;  %s670_s14 = smov 91   ;;  %s671_s15 = smov 94   ;;  %v191_v40 = vsel %vm190_vm12, %v569_v37, %v568_v36  ;;  %v570_v42 = vld [vmem:[%s942_s0 + $0x24] sm:$0x1]  }
   0xe   :  { %v178_v41 = vsel %vm177_vm13, %v567_v39, %v566_v38  ;;  %v571_v43 = vld [vmem:[%s942_s0 + $0x24] sm:$0x1]   ;;  %vm204_vm14 = vcmask 359424   ;;  %s672_s20 = smov 87   ;;  %s673_s21 = smov 90   ;;  %vm3_vm15 = vcmask 367616  }
   0xf   :  { %v572_v44 = vld [vmem:[%s942_s0 + $0x10] sm:$0x1]   ;;  %v205_v45 = vsel %vm204_vm14, %v571_v43, %v570_v42  ;;  %s675_s25 = smov 84   ;;  %v574_v46 = vld [vmem:[%s942_s0 + $0xd] sm:$0x1]   ;;  %s676_s30 = smov 73  }
  0x10   :  { %109 = vrot.lane.b32.xlu1 %v108_v22, %s666_s23  ;;  %95 = vrot.lane.b32.xlu0 %v94_v23, %s667_s24  ;;  %s674_s24 = smov 80   ;;  %v573_v47 = vld [vmem:[%s942_s0 + $0x21] sm:$0x1]   ;;  %v2_v48 = vld [vmem:[%s942_s0] sm:$0x1]   ;;  %s678_s9 = smov 66  }
  0x11   :  { %v576_v49 = vld [vmem:[%s942_s0 + $0xa] sm:$0x1]   ;;  %v575_v50 = vld [vmem:[%s942_s0 + $0x1e] sm:$0x1]   ;;  %4 = vst.msk [vmem:[#allocation0] sm:$0x1] %vm3_vm15, %v2_v48  }
  0x12   :  { %s679_s10 = smov 70   ;;  %v578_v51 = vld [vmem:[%s942_s0 + $0x2c] sm:$0x1]   ;;  %v577_v52 = vld [vmem:[%s942_s0 + $0x1b] sm:$0x1]   ;;  %s681_s16 = smov 63  }
  0x13   :  { %v580_v53 = vld [vmem:[%s942_s0 + $0x18] sm:$0x1]   ;;  %v579_v54 = vld [vmem:[%s942_s0 + $0x7] sm:$0x1]   ;;  %s683_s22 = smov 59   ;;  %s684_s27 = smov 52  }
  0x14   :  { %137 = vrot.lane.b32.xlu1 %v136_v28, %s668_s4  ;;  %123 = vrot.lane.b32.xlu0 %v122_v29, %s669_s5  ;;  %s677_s4 = smov 77   ;;  %v582_v55 = vld [vmem:[%s942_s0 + $0x4] sm:$0x1]   ;;  %v581_v56 = vld [vmem:[%s942_s0 + $0x29] sm:$0x1]   ;;  %s685_s28 = smov 53  }
  0x15   :  { %v584_v57 = vld [vmem:[%s942_s0 + $0x26] sm:$0x1]   ;;  %v583_v58 = vld [vmem:[%s942_s0 + $0x15] sm:$0x1]   ;;  %s687_s5 = smov 49   ;;  %s689_s11 = smov 45  }
  0x16   :  { %v586_v59 = vld [vmem:[%s942_s0 + $0x12] sm:$0x1]   ;;  %v585_v60 = vld [vmem:[%s942_s0 + $0x1] sm:$0x1]   ;;  %v588_v61 = vld [vmem:[%s942_s0 + $0xf] sm:$0x1]  }
  0x17   :  { %v587_v62 = vld [vmem:[%s942_s0 + $0x23] sm:$0x1]   ;;  %s691_s17 = smov 39   ;;  %v590_v63 = vld [vmem:[%s942_s0 + $0xc] sm:$0x1]   ;;  %s693_s23 = smov 32  }
  0x18   :  { %165 = vrot.lane.b32.xlu1 %v164_v34, %s670_s14  ;;  %151 = vrot.lane.b32.xlu0 %v150_v35, %s671_s15  ;;  %s680_s15 = smov 60   ;;  %v589_v0 = vld [vmem:[%s942_s0 + $0x20] sm:$0x1]   ;;  %v592_v1 = vld [vmem:[%s942_s0 + $0x9] sm:$0x1]   ;;  %s695_s29 = smov 25  }
  0x19   :  { %v591_v2 = vld [vmem:[%s942_s0 + $0x1d] sm:$0x1]   ;;  %v594_v3 = vld [vmem:[%s942_s0 + $0x2b] sm:$0x1]   ;;  %v593_v4 = vld [vmem:[%s942_s0 + $0x1a] sm:$0x1]  }
  0x1a   :  { %s697_s6 = smov 18   ;;  %v596_v5 = vld [vmem:[%s942_s0 + $0x17] sm:$0x1]   ;;  %v595_v6 = vld [vmem:[%s942_s0 + $0x6] sm:$0x1]   ;;  %s699_s12 = smov 14  }
  0x1b   :  { %v598_v7 = vld [vmem:[%s942_s0 + $0x3] sm:$0x1]   ;;  %v597_v8 = vld [vmem:[%s942_s0 + $0x28] sm:$0x1]   ;;  %s701_s18 = smov 8   ;;  %vm44_vm0 = vcmask 1048496  }
  0x1c   :  { %192 = vrot.lane.b32.xlu1 %v191_v40, %s672_s20  ;;  %179 = vrot.lane.b32.xlu0 %v178_v41, %s673_s21  ;;  %s682_s21 = smov 56   ;;  %v600_v9 = vld [vmem:[%s942_s0 + $0x25] sm:$0x1]   ;;  %v599_v10 = vld [vmem:[%s942_s0 + $0x14] sm:$0x1]   ;;  %s702_s0 = smov 1  }
  0x1d   :  { %vm13_vm1 = vcmask 343040   ;;  %vm16_vm2 = vcmask 1048552   ;;  %vm41_vm3 = vcmask 285696   ;;  %vm58_vm4 = vcmask 1048472  }
  0x1e   :  { %vm27_vm5 = vcmask 318464   ;;  %vm30_vm6 = vcmask 1048528   ;;  %vm55_vm7 = vcmask 261120   ;;  %vm83_vm8 = vcmask 203776  }
  0x1f   :  { %vm86_vm9 = vcmask 1048416   ;;  %vm69_vm10 = vcmask 228352   ;;  %vm72_vm11 = vcmask 1048440   ;;  %vm111_vm12 = vcmask 146432  }
  0x20   :  { %216 = vrot.lane.b32.xlu1 %v572_v44, %s674_s24  ;;  %206 = vrot.lane.b32.xlu0 %v205_v45, %s675_s25  ;;  %vm114_vm13 = vcmask 1048360   ;;  %vm97_vm14 = vcmask 171008   ;;  %vm100_vm15 = vcmask 1048384  }
  0x24   :  { %230 = vrot.lane.b32.xlu1 %v574_v46, %s676_s30  ;;  %223 = vrot.lane.b32.xlu0 %v573_v47, %s677_s4  ;;  %s686_s4 = smov 46  }
  0x28   :  { %244 = vrot.lane.b32.xlu1 %v576_v49, %s678_s9  ;;  %237 = vrot.lane.b32.xlu0 %v575_v50, %s679_s10  ;;  %s688_s10 = smov 42  }
  0x2c   :  { %258 = vrot.lane.b32.xlu1 %v578_v51, %s680_s15  ;;  %251 = vrot.lane.b32.xlu0 %v577_v52, %s681_s16  ;;  %s690_s16 = smov 35  }
  0x30   :  { %272 = vrot.lane.b32.xlu1 %v580_v53, %s682_s21  ;;  %265 = vrot.lane.b32.xlu0 %v579_v54, %s683_s22  ;;  %s692_s22 = smov 28  }
  0x34   :  { %286 = vrot.lane.b32.xlu1 %v582_v55, %s684_s27  ;;  %279 = vrot.lane.b32.xlu0 %v581_v56, %s685_s28  ;;  %s694_s28 = smov 21  }
  0x38   :  { %300 = vrot.lane.b32.xlu1 %v584_v57, %s686_s4  ;;  %293 = vrot.lane.b32.xlu0 %v583_v58, %s687_s5  ;;  %s696_s5 = smov 15  }
  0x3c   :  { %313 = vrot.lane.b32.xlu1 %v586_v59, %s688_s10  ;;  %307 = vrot.lane.b32.xlu0 %v585_v60, %s689_s11  ;;  %s698_s11 = smov 11  }
  0x40   :  { %327 = vrot.lane.b32.xlu1 %v588_v61, %s690_s16  ;;  %320 = vrot.lane.b32.xlu0 %v587_v62, %s691_s17  ;;  %s700_s17 = smov 7  }
  0x44   :  { %341 = vrot.lane.b32.xlu1 %v590_v63, %s692_s22  ;;  %334 = vrot.lane.b32.xlu0 %v589_v0, %s693_s23  ;;  %s703_s23 = smov 4  }
  0x48   :  { %355 = vrot.lane.b32.xlu1 %v592_v1, %s694_s28  ;;  %348 = vrot.lane.b32.xlu0 %v591_v2, %s695_s29 }
  0x4c   :  { %369 = vrot.lane.b32.xlu1 %v594_v3, %s696_s5  ;;  %362 = vrot.lane.b32.xlu0 %v593_v4, %s697_s6 }
  0x50   :  { %383 = vrot.lane.b32.xlu1 %v596_v5, %s698_s11  ;;  %376 = vrot.lane.b32.xlu0 %v595_v6, %s699_s12 }
  0x54   :  { %397 = vrot.lane.b32.xlu1 %v598_v7, %s700_s17  ;;  %390 = vrot.lane.b32.xlu0 %v597_v8, %s701_s18 }
  0x58   :  { %411 = vrot.lane.b32.xlu1 %v600_v9, %s702_s0  ;;  %404 = vrot.lane.b32.xlu0 %v599_v10, %s703_s23 }
  0x76   :  { %v40_v11 = vpop.permute.xlu1 %39   ;;  %v12_v12 = vpop.permute.xlu0 %11  }
  0x77   :  { %46 = vst.msk [vmem:[#allocation0 + $0x20] sm:$0x1] %vm44_vm0, %v40_v11   ;;  %vm139_vm0 = vcmask 113664  }
  0x78   :  { %15 = vst.msk [vmem:[#allocation0 + $0x30] sm:$0x1] %vm13_vm1, %v12_v12   ;;  %vm142_vm1 = vcmask 1048328  }
  0x79   :  { %18 = vst.msk [vmem:[#allocation0 + $0x28] sm:$0x1] %vm16_vm2, %v12_v12   ;;  %vm125_vm2 = vcmask 121856  }
  0x7a   :  { %43 = vst.msk [vmem:[#allocation0 + $0x28] sm:$0x1] %vm41_vm3, %v40_v11   ;;  %v54_v13 = vpop.permute.xlu1 %53   ;;  %v26_v14 = vpop.permute.xlu0 %25   ;;  %vm128_vm3 = vcmask 1048336  }
  0x7b   :  { %60 = vst.msk [vmem:[#allocation0 + $0x50] sm:$0x1] %vm58_vm4, %v54_v13   ;;  %vm167_vm4 = vcmask 64512  }
  0x7c   :  { %29 = vst.msk [vmem:[#allocation0 + $0x60] sm:$0x1] %vm27_vm5, %v26_v14   ;;  %vm170_vm5 = vcmask 1048280  }
  0x7d   :  { %32 = vst.msk [vmem:[#allocation0 + $0x58] sm:$0x1] %vm30_vm6, %v26_v14   ;;  %vm153_vm6 = vcmask 89088  }
  0x7e   :  { %57 = vst.msk [vmem:[#allocation0 + $0x58] sm:$0x1] %vm55_vm7, %v54_v13   ;;  %v82_v15 = vpop.permute.xlu1 %81   ;;  %v68_v16 = vpop.permute.xlu0 %67   ;;  %vm156_vm7 = vcmask 1048304  }
  0x7f   :  { %85 = vst.msk [vmem:[#allocation0 + $0x50] sm:$0x1] %vm83_vm8, %v82_v15   ;;  %vm194_vm8 = vcmask 31744  }
  0x80   :  { %88 = vst.msk [vmem:[#allocation0 + $0x48] sm:$0x1] %vm86_vm9, %v82_v15   ;;  %vm197_vm9 = vcmask 1048248  }
  0x81   :  { %71 = vst.msk [vmem:[#allocation0 + $0x20] sm:$0x1] %vm69_vm10, %v68_v16   ;;  %vm181_vm10 = vcmask 56320  }
  0x82   :  { %74 = vst.msk [vmem:[#allocation0 + $0x18] sm:$0x1] %vm72_vm11, %v68_v16   ;;  %v110_v17 = vpop.permute.xlu1 %109   ;;  %v96_v18 = vpop.permute.xlu0 %95   ;;  %vm184_vm11 = vcmask 1048272  }
  0x83   :  { %113 = vst.msk [vmem:[#allocation0 + $0x48] sm:$0x1] %vm111_vm12, %v110_v17   ;;  %vm218_vm12 = vcmask 1023616  }
  0x84   :  { %116 = vst.msk [vmem:[#allocation0 + $0x40] sm:$0x1] %vm114_vm13, %v110_v17   ;;  %vm208_vm13 = vcmask 7168  }
  0x85   :  { %99 = vst.msk [vmem:[#allocation0 + $0x18] sm:$0x1] %vm97_vm14, %v96_v18   ;;  %vm211_vm14 = vcmask 1048224  }
  0x86   :  { %102 = vst.msk [vmem:[#allocation0 + $0x10] sm:$0x1] %vm100_vm15, %v96_v18   ;;  %v138_v19 = vpop.permute.xlu1 %137   ;;  %v124_v20 = vpop.permute.xlu0 %123   ;;  %vm232_vm15 = vcmask 966216  }
  0x87   :  { %141 = vst.msk [vmem:[#allocation0 + $0x10] sm:$0x1] %vm139_vm0, %v138_v19   ;;  %vm225_vm0 = vcmask 999016  }
  0x88   :  { %144 = vst.msk [vmem:[#allocation0 + $0x8] sm:$0x1] %vm142_vm1, %v138_v19   ;;  %vm246_vm1 = vcmask 908816  }
  0x89   :  { %127 = vst.msk [vmem:[#allocation0 + $0x78] sm:$0x1] %vm125_vm2, %v124_v20   ;;  %vm239_vm2 = vcmask 941616  }
  0x8a   :  { %130 = vst.msk [vmem:[#allocation0 + $0x70] sm:$0x1] %vm128_vm3, %v124_v20   ;;  %v166_v21 = vpop.permute.xlu1 %165   ;;  %v152_v22 = vpop.permute.xlu0 %151   ;;  %vm260_vm3 = vcmask 859616  }
  0x8b   :  { %169 = vst.msk [vmem:[#allocation0 + $0x70] sm:$0x1] %vm167_vm4, %v166_v21   ;;  %vm253_vm4 = vcmask 884216  }
  0x8c   :  { %172 = vst.msk [vmem:[#allocation0 + $0x68] sm:$0x1] %vm170_vm5, %v166_v21   ;;  %vm274_vm5 = vcmask 826816  }
  0x8d   :  { %155 = vst.msk [vmem:[#allocation0 + $0x40] sm:$0x1] %vm153_vm6, %v152_v22   ;;  %vm267_vm6 = vcmask 851416  }
  0x8e   :  { %158 = vst.msk [vmem:[#allocation0 + $0x38] sm:$0x1] %vm156_vm7, %v152_v22   ;;  %v193_v23 = vpop.permute.xlu1 %192   ;;  %v180_v24 = vpop.permute.xlu0 %179   ;;  %vm288_vm7 = vcmask 794016  }
  0x8f   :  { %196 = vst.msk [vmem:[#allocation0 + $0x38] sm:$0x1] %vm194_vm8, %v193_v23   ;;  %vm281_vm8 = vcmask 802216  }
  0x90   :  { %199 = vst.msk [vmem:[#allocation0 + $0x30] sm:$0x1] %vm197_vm9, %v193_v23   ;;  %vm302_vm9 = vcmask 744816  }
  0x91   :  { %183 = vst.msk [vmem:[#allocation0 + $0x8] sm:$0x1] %vm181_vm10, %v180_v24   ;;  %vm295_vm10 = vcmask 769416  }
  0x92   :  { %185 = vst.msk [vmem:[#allocation0] sm:$0x1] %vm184_vm11, %v180_v24   ;;  %v217_v25 = vpop.permute.xlu1 %216   ;;  %v207_v26 = vpop.permute.xlu0 %206   ;;  %vm315_vm11 = vcmask 712016  }
  0x93   :  { %220 = vst.msk [vmem:[#allocation0 + $0x28] sm:$0x1] %vm218_vm12, %v217_v25   ;;  %vm309_vm12 = vcmask 736616  }
  0x94   :  { %210 = vst.msk [vmem:[#allocation0 + $0x68] sm:$0x1] %vm208_vm13, %v207_v26   ;;  %vm329_vm13 = vcmask 654616  }
  0x95   :  { %213 = vst.msk [vmem:[#allocation0 + $0x60] sm:$0x1] %vm211_vm14, %v207_v26   ;;  %vm322_vm14 = vcmask 687416  }
  0x96   :  { %v231_v27 = vpop.permute.xlu1 %230   ;;  %v224_v28 = vpop.permute.xlu0 %223  }
  0x97   :  { %234 = vst.msk [vmem:[#allocation0 + $0x20] sm:$0x1] %vm232_vm15, %v231_v27   ;;  %vm343_vm15 = vcmask 597216  }
  0x98   :  { %227 = vst.msk [vmem:[#allocation0 + $0x58] sm:$0x1] %vm225_vm0, %v224_v28   ;;  %vm336_vm0 = vcmask 630016  }
  0x9a   :  { %v245_v29 = vpop.permute.xlu1 %244   ;;  %v238_v30 = vpop.permute.xlu0 %237  }
  0x9b   :  { %248 = vst.msk [vmem:[#allocation0 + $0x18] sm:$0x1] %vm246_vm1, %v245_v29   ;;  %vm357_vm1 = vcmask 539816  }
  0x9c   :  { %241 = vst.msk [vmem:[#allocation0 + $0x50] sm:$0x1] %vm239_vm2, %v238_v30   ;;  %vm350_vm2 = vcmask 572616  }
  0x9e   :  { %v259_v31 = vpop.permute.xlu1 %258   ;;  %v252_v32 = vpop.permute.xlu0 %251  }
  0x9f   :  { %262 = vst.msk [vmem:[#allocation0 + $0x78] sm:$0x1] %vm260_vm3, %v259_v31   ;;  %vm371_vm3 = vcmask 490616  }
  0xa0   :  { %255 = vst.msk [vmem:[#allocation0 + $0x48] sm:$0x1] %vm253_vm4, %v252_v32   ;;  %vm364_vm4 = vcmask 515216  }
  0xa2   :  { %v273_v33 = vpop.permute.xlu1 %272   ;;  %v266_v34 = vpop.permute.xlu0 %265  }
  0xa3   :  { %276 = vst.msk [vmem:[#allocation0 + $0x40] sm:$0x1] %vm274_vm5, %v273_v33   ;;  %vm385_vm5 = vcmask 457816  }
  0xa4   :  { %269 = vst.msk [vmem:[#allocation0 + $0x10] sm:$0x1] %vm267_vm6, %v266_v34   ;;  %vm378_vm6 = vcmask 482416  }
  0xa6   :  { %v287_v35 = vpop.permute.xlu1 %286   ;;  %v280_v36 = vpop.permute.xlu0 %279  }
  0xa7   :  { %290 = vst.msk [vmem:[#allocation0 + $0x8] sm:$0x1] %vm288_vm7, %v287_v35   ;;  %vm399_vm7 = vcmask 425016  }
  0xa8   :  { %283 = vst.msk [vmem:[#allocation0 + $0x70] sm:$0x1] %vm281_vm8, %v280_v36   ;;  %vm392_vm8 = vcmask 433216  }
  0xaa   :  { %v301_v37 = vpop.permute.xlu1 %300   ;;  %v294_v38 = vpop.permute.xlu0 %293  }
  0xab   :  { %304 = vst.msk [vmem:[#allocation0 + $0x68] sm:$0x1] %vm302_vm9, %v301_v37   ;;  %vm413_vm9 = vcmask 375816  }
  0xac   :  { %297 = vst.msk [vmem:[#allocation0 + $0x38] sm:$0x1] %vm295_vm10, %v294_v38   ;;  %vm406_vm10 = vcmask 400416  }
  0xae   :  { %v314_v39 = vpop.permute.xlu1 %313   ;;  %v308_v40 = vpop.permute.xlu0 %307  }
  0xaf   :  { %317 = vst.msk [vmem:[#allocation0 + $0x30] sm:$0x1] %vm315_vm11, %v314_v39  }
  0xb0   :  { %310 = vst.msk [vmem:[#allocation0] sm:$0x1] %vm309_vm12, %v308_v40  }
  0xb2   :  { %v328_v41 = vpop.permute.xlu1 %327   ;;  %v321_v42 = vpop.permute.xlu0 %320  }
  0xb3   :  { %331 = vst.msk [vmem:[#allocation0 + $0x28] sm:$0x1] %vm329_vm13, %v328_v41  }
  0xb4   :  { %324 = vst.msk [vmem:[#allocation0 + $0x60] sm:$0x1] %vm322_vm14, %v321_v42  }
  0xb6   :  { %v459_v43 = vld [vmem:[#allocation0 + $0x30] sm:$0x1]  ;;  %v342_v44 = vpop.permute.xlu1 %341   ;;  %v335_v46 = vpop.permute.xlu0 %334  }
  0xb7   :  { %606 = vst [vmem:[%s943_s1 + $0x6] sm:$0x1] %v459_v43  ;;  %v420_v45 = vld [vmem:[#allocation0] sm:$0x1]  ;;  %345 = vst.msk [vmem:[#allocation0 + $0x20] sm:$0x1] %vm343_vm15, %v342_v44  }
  0xb8   :  { %423 = vst [vmem:[%s943_s1] sm:$0x1] %v420_v45  ;;  %338 = vst.msk [vmem:[#allocation0 + $0x58] sm:$0x1] %vm336_vm0, %v335_v46  }
  0xba   :  { %v452_v47 = vld [vmem:[#allocation0 + $0x28] sm:$0x1]  ;;  %v356_v48 = vpop.permute.xlu1 %355   ;;  %v349_v50 = vpop.permute.xlu0 %348  }
  0xbb   :  { %605 = vst [vmem:[%s943_s1 + $0x5] sm:$0x1] %v452_v47  ;;  %v501_v49 = vld [vmem:[#allocation0 + $0x60] sm:$0x1]  ;;  %359 = vst.msk [vmem:[#allocation0 + $0x18] sm:$0x1] %vm357_vm1, %v356_v48  }
  0xbc   :  { %612 = vst [vmem:[%s943_s1 + $0xc] sm:$0x1] %v501_v49  ;;  %352 = vst.msk [vmem:[#allocation0 + $0x50] sm:$0x1] %vm350_vm2, %v349_v50  }
  0xbe   :  { %v445_v51 = vld [vmem:[#allocation0 + $0x20] sm:$0x1]  ;;  %v370_v52 = vpop.permute.xlu1 %369   ;;  %v363_v54 = vpop.permute.xlu0 %362  }
  0xbf   :  { %604 = vst [vmem:[%s943_s1 + $0x4] sm:$0x1] %v445_v51  ;;  %v494_v53 = vld [vmem:[#allocation0 + $0x58] sm:$0x1]  ;;  %373 = vst.msk [vmem:[#allocation0 + $0x78] sm:$0x1] %vm371_vm3, %v370_v52  }
  0xc0   :  { %611 = vst [vmem:[%s943_s1 + $0xb] sm:$0x1] %v494_v53  ;;  %366 = vst.msk [vmem:[#allocation0 + $0x48] sm:$0x1] %vm364_vm4, %v363_v54  }
  0xc2   :  { %v438_v55 = vld [vmem:[#allocation0 + $0x18] sm:$0x1]  ;;  %v384_v56 = vpop.permute.xlu1 %383   ;;  %v377_v58 = vpop.permute.xlu0 %376  }
  0xc3   :  { %603 = vst [vmem:[%s943_s1 + $0x3] sm:$0x1] %v438_v55  ;;  %v487_v57 = vld [vmem:[#allocation0 + $0x50] sm:$0x1]  ;;  %387 = vst.msk [vmem:[#allocation0 + $0x40] sm:$0x1] %vm385_vm5, %v384_v56  }
  0xc4   :  { %610 = vst [vmem:[%s943_s1 + $0xa] sm:$0x1] %v487_v57  ;;  %380 = vst.msk [vmem:[#allocation0 + $0x10] sm:$0x1] %vm378_vm6, %v377_v58  }
  0xc6   :  { %v522_v59 = vld [vmem:[#allocation0 + $0x78] sm:$0x1]  ;;  %v398_v60 = vpop.permute.xlu1 %397   ;;  %v391_v62 = vpop.permute.xlu0 %390  }
  0xc7   :  { %615 = vst [vmem:[%s943_s1 + $0xf] sm:$0x1] %v522_v59  ;;  %v480_v61 = vld [vmem:[#allocation0 + $0x48] sm:$0x1]  ;;  %401 = vst.msk [vmem:[#allocation0 + $0x8] sm:$0x1] %vm399_vm7, %v398_v60  }
  0xc8   :  { %609 = vst [vmem:[%s943_s1 + $0x9] sm:$0x1] %v480_v61  ;;  %394 = vst.msk [vmem:[#allocation0 + $0x70] sm:$0x1] %vm392_vm8, %v391_v62  }
  0xca   :  { %v473_v63 = vld [vmem:[#allocation0 + $0x40] sm:$0x1]  ;;  %v412_v0 = vpop.permute.xlu1 %411   ;;  %v405_v2 = vpop.permute.xlu0 %404  }
  0xcb   :  { %608 = vst [vmem:[%s943_s1 + $0x8] sm:$0x1] %v473_v63  ;;  %v431_v1 = vld [vmem:[#allocation0 + $0x10] sm:$0x1]  ;;  %415 = vst.msk [vmem:[#allocation0 + $0x68] sm:$0x1] %vm413_vm9, %v412_v0  }
  0xcc   :  { %602 = vst [vmem:[%s943_s1 + $0x2] sm:$0x1] %v431_v1  ;;  %408 = vst.msk [vmem:[#allocation0 + $0x38] sm:$0x1] %vm406_vm10, %v405_v2  }
  0xce   :  { %v425_v3 = vld [vmem:[#allocation0 + $0x8] sm:$0x1] }
  0xcf   :  { %601 = vst [vmem:[%s943_s1 + $0x1] sm:$0x1] %v425_v3  ;;  %v515_v4 = vld [vmem:[#allocation0 + $0x70] sm:$0x1] }
  0xd0   :  { %614 = vst [vmem:[%s943_s1 + $0xe] sm:$0x1] %v515_v4 }
  0xd2   :  { %v508_v5 = vld [vmem:[#allocation0 + $0x68] sm:$0x1] }
  0xd3   :  { %613 = vst [vmem:[%s943_s1 + $0xd] sm:$0x1] %v508_v5  ;;  %v466_v6 = vld [vmem:[#allocation0 + $0x38] sm:$0x1] }
  0xd4   :  { %607 = vst [vmem:[%s943_s1 + $0x7] sm:$0x1] %v466_v6 }

// kernel: foldnet_decoder_forward.1
= control target key start
LH: loop header
LB: loop body
LE: loop exit
PB: predicated region body
PF: predicated region fallthrough
CT: control target
= control target key end

     0   :  { %s2887_s17 = smov 0   ;;  %s2889_s18 = smov 0   ;;  %s3456_s0 = inlined_call_operand.vmem [shape: f32[2,2048], index: 0, kind: input, shape index: {}]   ;;  %s3457_s1 = inlined_call_operand.vmem [shape: f32[2,32,1], index: 1, kind: input, shape index: {}]   ;;  %s3458_s2 = inlined_call_operand.vmem [shape: f32[2,32,1], index: 2, kind: input, shape index: {}]   ;;  %s3459_s3 = inlined_call_operand.vmem [shape: f32[32,2], index: 3, kind: input, shape index: {}]   ;;  %s3460_s4 = inlined_call_operand.vmem [shape: f32[32,32], index: 4, kind: input, shape index: {}]   ;;  %s3461_s5 = inlined_call_operand.vmem [shape: f32[32,32], index: 5, kind: input, shape index: {}]   ;;  %s3462_s6 = inlined_call_operand.vmem [shape: f32[32,32], index: 6, kind: input, shape index: {}]   ;;  %s3463_s7 = inlined_call_operand.vmem [shape: f32[3,32], index: 7, kind: input, shape index: {}]   ;;  %s3464_s8 = inlined_call_operand.vmem [shape: f32[32,1], index: 8, kind: input, shape index: {}]   ;;  %s3465_s9 = inlined_call_operand.vmem [shape: f32[32,1], index: 9, kind: input, shape index: {}]   ;;  %s3466_s10 = inlined_call_operand.vmem [shape: f32[3,1], index: 10, kind: input, shape index: {}]   ;;  %s3467_s11 = inlined_call_operand.vmem [shape: f32[2,3,2048], index: 11, kind: output, shape index: {}]  }
   0x1   :  { %s2891_s19 = smov 0   ;;  %s2893_s20 = smov 0  }
   0x2   :  { %s2895_s21 = smov 0  }
   0x3 LB: > { %s30_s22 = sadd.s32 1, %s2814_s19  ;;  %s33_s23 = sadd.s32 1, %s2818_s20  ;;  %s2822_s21 = sphi %s2895_s21, %s21_s21   ;;  %s2818_s20 = sphi %s2893_s20, %s3471_s20   ;;  %s2814_s19 = sphi %s2891_s19, %s3470_s19   ;;  %s2810_s18 = sphi %s2889_s18, %s3469_s18   ;;  %s2806_s17 = sphi %s2887_s17, %s3468_s17  }
   0x4   : > { %p31_p0 = scmp.ge.s32.totalorder %s30_s22, 2  ;;  %p2647_p1 = scmp.ge.s32.totalorder %s2822_s21, 1 }
   0x5   : > { %p372_p2 = scmp.lt.s32.totalorder %s2822_s21, 5 }
   0x6   : > { %s3473_s22 = smov (%p31_p0, %s30_s22), 0  ;;  %s3475_s23 = smov (!%p31_p0, %s33_s23), %s2818_s20 }
   0x7   : > { %p373_p3 = pnand %p2647_p1, %p372_p2  ;;  %p35_p4 = scmp.ge.s32.totalorder %s3475_s23, 2 }
   0x8   : > { %s2648_s24 = sshll.u32 (!%p373_p3), %s2806_s17, 3  ;;  %p432_p6 = scmp.lt.s32.totalorder (!%p373_p3), %s2810_s18, 1 }
   0x9   : > { %s3477_s23 = smov (%p35_p4, %s3475_s23), 0  ;;  %376 = sbr.rel (%p373_p3) target bundleno = 1128 (0x468), region = 64 }
   0xa   : > { %p427_p5 = scmp.lt.s32.totalorder (!%p373_p3), %s2648_s24, 15 }
   0xe   : > { %v492_v0 = vlaneseq  ;;  %v2824_v1 = vmov 1983009808   ;;  %v2825_v3 = vmov 0.0   ;;  %v2826_v5 = vmov 0   ;;  %s3479_s24 = smov (!%p427_p5, %s2648_s24), 15  ;;  %s3481_s18 = smov (!%p432_p6, %s2810_s18), 1 }
   0xf   : > { %v490_v2 = vunpack.c.l.s4 %v2824_v1  ;;  %616 = vmatprep.mubr.f32.mxu0 %v2825_v3  ;;  %705 = vmatprep.mubr.f32.mxu1 %v2825_v3  ;;  %s2649_s25 = sshll.u32 %s3479_s24, 1  ;;  %s2735_s29 = sshll.u32 %s3481_s18, 5  ;;  %vm535_vm0 = vcmask 1041408   ;;  %v462_v20 = vld [vmem:[%s3459_s3] sm:$0xff]  ;;  %vm522_vm1 = vcmask 15360   ;;  %v463_v24 = vld [vmem:[%s3459_s3 + $0x8] sm:$0xff] }
  0x10   : > { %v493_v4 = vshrl.u32 %v492_v0, 7  ;;  %2780 = vset.pattern.permute.xlu0 %v2826_v5  ;;  %2781 = vset.pattern.permute.xlu1 %v2826_v5  ;;  %s430_s28 = scalar_lea.vmem %s3456_s0, %s2649_s25  ;;  %s2940_s13 = scalar_lea.vmem %s3457_s1, %s2735_s29  ;;  %v947_v25 = vld [vmem:[%s3464_s8 + $0x18] sm:$0xff]  ;;  %v464_v27 = vld [vmem:[%s3459_s3 + $0x10] sm:$0xff]  ;;  %v945_v28 = vld [vmem:[%s3464_s8 + $0x8] sm:$0xff]  ;;  %vm968_vm2 = vcmask 261120  }
  0x11   : > { %v491_v6 = vunpack.c.0.s8 %v490_v2  ;;  %v452_v8 = vld [vmem:[%s430_s28] sm:$0xff]  ;;  %v453_v9 = vld [vmem:[%s430_s28 + $0x8] sm:$0xff]  ;;  %v457_v14 = vld [vmem:[%s2940_s13 + $0x18] sm:$0xff]  ;;  %s441_s15 = scalar_lea.vmem %s3458_s2, %s2735_s29  ;;  %s2655_s28 = sshll.u32 %s3481_s18, 4 }
  0x12   : > { %v505_v11 = vcombine.high %v453_v9, %v453_v9  ;;  %v488_v13 = vcombine.high %v452_v8, %v452_v8  ;;  %v455_v15 = vld [vmem:[%s2940_s13 + $0x8] sm:$0xff]  ;;  %483 = vperm.xlu0 %2780, %v457_v14   ;;  %v456_v19 = vld [vmem:[%s2940_s13 + $0x10] sm:$0xff]  ;;  %v454_v26 = vld [vmem:[%s2940_s13] sm:$0xff]  ;;  %s448_s30 = sadd.s32 %s2655_s28, %s3479_s24 }
  0x13   : > { %v494_v7 = vsub.s32 %v491_v6, %v493_v4  ;;  %473 = vperm.xlu1 %2781, %v455_v15   ;;  %v946_v29 = vld [vmem:[%s3464_s8 + $0x10] sm:$0xff]  ;;  %v465_v30 = vld [vmem:[%s3459_s3 + $0x18] sm:$0xff]  ;;  %v944_v32 = vld [vmem:[%s3464_s8] sm:$0xff]  ;;  %s2656_s12 = sshll.u32 %s448_s30, 2 }
  0x14   : > { %v461_v31 = vld [vmem:[%s441_s15 + $0x18] sm:$0xff]  ;;  %v459_v33 = vld [vmem:[%s441_s15 + $0x8] sm:$0xff]  ;;  %v460_v34 = vld [vmem:[%s441_s15 + $0x10] sm:$0xff]  ;;  %s450_s16 = scalar_lea.vmem %s3467_s11, %s2656_s12 }
  0x15   : > { %v495_v10 = vrot.slane %v452_v8, %v494_v7  ;;  %v512_v12 = vrot.slane %v453_v9, %v494_v7  ;;  %v502_v17 = vrot.slane %v488_v13, %v494_v7  ;;  %v519_v18 = vrot.slane %v505_v11, %v494_v7  ;;  %v1800_v35 = vld [vmem:[%s3465_s9 + $0x18] sm:$0xff]  ;;  %v458_v36 = vld [vmem:[%s441_s15] sm:$0xff]  ;;  %v1798_v37 = vld [vmem:[%s3465_s9 + $0x8] sm:$0xff] }
  0x16   : > { %478 = vperm.xlu0 %2780, %v456_v19   ;;  %v1799_v38 = vld [vmem:[%s3465_s9 + $0x10] sm:$0xff]  ;;  %v2222_v39 = vld [vmem:[%s3466_s10] sm:$0x7] }
  0x17   : > { %v503_v16 = vcombine.high %v495_v10, %v495_v10  ;;  %v504_v21 = vcombine.high %v502_v17, %v502_v17  ;;  %v520_v22 = vcombine.high %v512_v12, %v512_v12  ;;  %v521_v23 = vcombine.high %v519_v18, %v519_v18  ;;  %468 = vperm.xlu1 %2781, %v454_v26   ;;  %v1797_v40 = vld [vmem:[%s3465_s9] sm:$0xff] }
  0x19   : > { %2657 = vmatprep.subr.msk.mxu0 %vm535_vm0, %v503_v16  ;;  %2663 = vmatprep.subr.msk.mxu1 %vm535_vm0, %v504_v21 }
  0x1a   : > { %2658 = vmatpush1.msk.msra.mxu0 %vm535_vm0, %v495_v10  ;;  %2664 = vmatpush1.msk.msra.mxu1 %vm535_vm0, %v502_v17 }
  0x1b   : > { %2659 = vmatmul.mubr.msk.f32.vlgmr.msra.gmra.mxu0 %vm522_vm1, %v462_v20  ;;  %2665 = vmatmul.mubr.msk.f32.vlgmr.msra.gmra.mxu1 %vm522_vm1, %v462_v20 }
  0x1c   : > { %622 = vmatprep.mubr.f32.mxu0 %v2825_v3  ;;  %2669 = vmatprep.subr.msk.mxu0 %vm535_vm0, %v520_v22 }
  0x1d   : > { %711 = vmatprep.mubr.f32.mxu1 %v2825_v3  ;;  %2675 = vmatprep.subr.msk.mxu1 %vm535_vm0, %v521_v23 }
  0x1e   : > { %2676 = vmatpush1.msk.msra.mxu1 %vm535_vm0, %v519_v18  ;;  %2670 = vmatpush1.msk.msra.mxu0 %vm535_vm0, %v512_v12 }
  0x1f   : > { %2660 = vmatmul.mubr.msk.f32.gmra.mxu0 %vm522_vm1, %v463_v24  ;;  %2666 = vmatmul.mubr.msk.f32.gmra.mxu1 %vm522_vm1, %v463_v24 }
  0x20   : > { %628 = vmatprep.mubr.f32.mxu0 %v2825_v3  ;;  %965 = vperm.xlu0 %2780, %v947_v25  }
  0x21   : > { %717 = vmatprep.mubr.f32.mxu1 %v2825_v3  ;;  %960 = vperm.xlu1 %2781, %v946_v29  }
  0x23   : > { %2661 = vmatmul.mubr.msk.f32.gmra.mxu0 %vm522_vm1, %v464_v27  ;;  %2667 = vmatmul.mubr.msk.f32.gmra.mxu1 %vm522_vm1, %v464_v27 }
  0x24   : > { %634 = vmatprep.mubr.f32.mxu0 %v2825_v3  ;;  %955 = vperm.xlu0 %2780, %v945_v28  }
  0x25   : > { %723 = vmatprep.mubr.f32.mxu1 %v2825_v3  ;;  %950 = vperm.xlu1 %2781, %v944_v32  }
  0x27   : > { %2662 = vmatmul.mubr.msk.f32.gmra.mxu0 %vm522_vm1, %v465_v30  ;;  %2668 = vmatmul.mubr.msk.f32.gmra.mxu1 %vm522_vm1, %v465_v30 }
  0x28   : > { %794 = vmatprep.mubr.f32.mxu0 %v2825_v3  ;;  %1390 = vperm.xlu0 %2780, %v461_v31  }
  0x29   : > { %883 = vmatprep.mubr.f32.mxu1 %v2825_v3  ;;  %1385 = vperm.xlu1 %2781, %v460_v34  }
  0x2b   : > { %2671 = vmatmul.mubr.msk.f32.vlgmr.msra.gmra.mxu0 %vm522_vm1, %v462_v20  ;;  %2677 = vmatmul.mubr.msk.f32.vlgmr.msra.gmra.mxu1 %vm522_vm1, %v462_v20 }
  0x2c   : > { %800 = vmatprep.mubr.f32.mxu0 %v2825_v3  ;;  %1380 = vperm.xlu0 %2780, %v459_v33  }
  0x2d   : > { %889 = vmatprep.mubr.f32.mxu1 %v2825_v3  ;;  %1375 = vperm.xlu1 %2781, %v458_v36  }
  0x2f   : > { %2672 = vmatmul.mubr.msk.f32.gmra.mxu0 %vm522_vm1, %v463_v24  ;;  %2678 = vmatmul.mubr.msk.f32.gmra.mxu1 %vm522_vm1, %v463_v24 }
  0x30   : > { %806 = vmatprep.mubr.f32.mxu0 %v2825_v3  ;;  %1818 = vperm.xlu0 %2780, %v1800_v35  }
  0x31   : > { %895 = vmatprep.mubr.f32.mxu1 %v2825_v3  ;;  %1813 = vperm.xlu1 %2781, %v1799_v38  }
  0x33   : > { %2673 = vmatmul.mubr.msk.f32.gmra.mxu0 %vm522_vm1, %v464_v27  ;;  %2679 = vmatmul.mubr.msk.f32.gmra.mxu1 %vm522_vm1, %v464_v27 }
  0x34   : > { %812 = vmatprep.mubr.f32.mxu0 %v2825_v3  ;;  %1808 = vperm.xlu0 %2780, %v1798_v37   ;;  %v3067_v37 = vld [vmem:[%s3460_s4] sm:$0xff] }
  0x35   : > { %901 = vmatprep.mubr.f32.mxu1 %v2825_v3  ;;  %1803 = vperm.xlu1 %2781, %v1797_v40  }
  0x37   : > { %2674 = vmatmul.mubr.msk.f32.gmra.mxu0 %vm522_vm1, %v465_v30  ;;  %2680 = vmatmul.mubr.msk.f32.gmra.mxu1 %vm522_vm1, %v465_v30 }
  0x38   : > { %1045 = vmatprep.mubr.f32.mxu0 %v2825_v3  ;;  %2225 = vperm.xlu0 %2780, %v2222_v39  }
  0x39   : > { %1134 = vmatprep.mubr.f32.mxu1 %v2825_v3 }
  0x8d   : > { %v3030_v48 = vpop.permute.xlu0 %483 }
  0x8e   : > { %v3032_v53 = vpop.permute.xlu1 %473 }
  0x91   : > { %v3034_v56 = vpop.permute.xlu0 %478 }
  0x92   : > { %v3043_v4 = vpop.permute.xlu1 %468 }
  0xdb   : > { %v618_v41 = vpop.f32.mrf.mxu0  ;;  %v707_v43 = vpop.f32.mrf.mxu1 }
  0xdc   : > { %v619_v17 = vadd.f32 %v618_v41, %v3043_v4  ;;  %v708_v26 = vadd.f32 %v707_v43, %v3043_v4 }
  0xdd   : > { %v620_v42 = vpop.f32.mrf.mxu0  ;;  %v709_v45 = vpop.f32.mrf.mxu1 }
  0xde   : > { %v621_v13 = vadd.f32 %v620_v42, %v3043_v4  ;;  %v710_v23 = vadd.f32 %v709_v45, %v3043_v4  ;;  %v908_v33 = vmax.f32 %v619_v17, 0.0  ;;  %v910_v39 = vmax.f32 %v708_v26, 0.0 }
  0xdf   : > { %v624_v44 = vpop.f32.mrf.mxu0  ;;  %v713_v47 = vpop.f32.mrf.mxu1 }
  0xe0   : > { %v625_v9 = vadd.f32 %v624_v44, %v3032_v53  ;;  %v714_v18 = vadd.f32 %v713_v47, %v3032_v53  ;;  %v909_v31 = vmax.f32 %v621_v13, 0.0  ;;  %v911_v38 = vmax.f32 %v710_v23, 0.0  ;;  %v3075_v44 = vld [vmem:[%s3460_s4 + $0x8] sm:$0xff] }
  0xe1   : > { %v626_v46 = vpop.f32.mrf.mxu0  ;;  %v715_v50 = vpop.f32.mrf.mxu1 }
  0xe2   : > { %v627_v5 = vadd.f32 %v626_v46, %v3032_v53  ;;  %v716_v14 = vadd.f32 %v715_v50, %v3032_v53  ;;  %v916_v27 = vmax.f32 %v625_v9, 0.0  ;;  %v918_v34 = vmax.f32 %v714_v18, 0.0 }
  0xe3   : > { %v630_v49 = vpop.f32.mrf.mxu0  ;;  %v719_v52 = vpop.f32.mrf.mxu1 }
  0xe4   : > { %v631_v62 = vadd.f32 %v630_v49, %v3034_v56  ;;  %v720_v10 = vadd.f32 %v719_v52, %v3034_v56  ;;  %v917_v24 = vmax.f32 %v627_v5, 0.0  ;;  %v919_v32 = vmax.f32 %v716_v14, 0.0 }
  0xe5   : > { %v632_v51 = vpop.f32.mrf.mxu0  ;;  %v721_v55 = vpop.f32.mrf.mxu1 }
  0xe6   : > { %v633_v60 = vadd.f32 %v632_v51, %v3034_v56  ;;  %v722_v6 = vadd.f32 %v721_v55, %v3034_v56  ;;  %v924_v19 = vmax.f32 %v631_v62, 0.0  ;;  %v926_v28 = vmax.f32 %v720_v10, 0.0 }
  0xe7   : > { %v636_v54 = vpop.f32.mrf.mxu0  ;;  %v725_v59 = vpop.f32.mrf.mxu1 }
  0xe8   : > { %v637_v57 = vadd.f32 %v636_v54, %v3030_v48  ;;  %v726_v0 = vadd.f32 %v725_v59, %v3030_v48  ;;  %v925_v15 = vmax.f32 %v633_v60, 0.0  ;;  %v927_v25 = vmax.f32 %v722_v6, 0.0  ;;  %v3090_v54 = vld [vmem:[%s3460_s4 + $0x10] sm:$0xff]  ;;  %v943_v6 = vld [vmem:[%s3460_s4 + $0x18] sm:$0xff] }
  0xe9   : > { %v638_v58 = vpop.f32.mrf.mxu0  ;;  %v727_v1 = vpop.f32.mrf.mxu1 }
  0xea   : > { %v639_v61 = vadd.f32 %v638_v58, %v3030_v48  ;;  %v932_v63 = vmax.f32 %v637_v57, 0.0  ;;  %v728_v8 = vadd.f32 %v727_v1, %v3030_v48  ;;  %v934_v20 = vmax.f32 %v726_v0, 0.0 }
  0xeb   : > { %v3041_v2 = vpop.f32.mrf.mxu0  ;;  %v3052_v12 = vpop.f32.mrf.mxu1 }
  0xec   : > { %v933_v7 = vmax.f32 %v639_v61, 0.0  ;;  %v935_v16 = vmax.f32 %v728_v8, 0.0  ;;  %v797_v9 = vadd.f32 %v3041_v2, %v3043_v4  ;;  %v886_v2 = vadd.f32 %v3052_v12, %v3043_v4 }
  0xed   : > { %v3050_v11 = vpop.f32.mrf.mxu0  ;;  %v3058_v22 = vpop.f32.mrf.mxu1 }
  0xee   : > { %1005 = vmatprep.subr.mxu0 %v933_v7  ;;  %1094 = vmatprep.subr.mxu1 %v935_v16  ;;  %v912_v18 = vmax.f32 %v797_v9, 0.0 }
  0xef   : > { %v802_v21 = vpop.f32.mrf.mxu0  ;;  %1006 = vmatpush1.msra.mxu0 %v932_v63  ;;  %v3062_v30 = vpop.f32.mrf.mxu1  ;;  %1095 = vmatpush1.msra.mxu1 %v934_v20  ;;  %v914_v20 = vmax.f32 %v886_v2, 0.0 }
  0xf0   : > { %1007 = vmatprep.subr.mxu0 %v925_v15  ;;  %1096 = vmatprep.subr.mxu1 %v927_v25  ;;  %v803_v62 = vadd.f32 %v802_v21, %v3032_v53  ;;  %v892_v13 = vadd.f32 %v3062_v30, %v3032_v53  ;;  %v888_v15 = vadd.f32 %v3058_v22, %v3043_v4 }
  0xf1   : > { %v804_v29 = vpop.f32.mrf.mxu0  ;;  %1008 = vmatpush1.msra.mxu0 %v924_v19  ;;  %v893_v36 = vpop.f32.mrf.mxu1  ;;  %1097 = vmatpush1.msra.mxu1 %v926_v28 }
  0xf2   : > { %1009 = vmatprep.subr.mxu0 %v917_v24  ;;  %1098 = vmatprep.subr.mxu1 %v919_v32  ;;  %v805_v59 = vadd.f32 %v804_v29, %v3032_v53  ;;  %v894_v7 = vadd.f32 %v893_v36, %v3032_v53  ;;  %v922_v53 = vmax.f32 %v892_v13, 0.0  ;;  %v915_v19 = vmax.f32 %v888_v15, 0.0  ;;  %v3147_v28 = vpop.permute.xlu0 %965 }
  0xf3   : > { %v808_v35 = vpop.f32.mrf.mxu0  ;;  %1010 = vmatpush1.msra.mxu0 %v916_v27  ;;  %v897_v41 = vpop.f32.mrf.mxu1  ;;  %1099 = vmatpush1.msra.mxu1 %v918_v34 }
  0xf4   : > { %1011 = vmatprep.subr.mxu0 %v909_v31  ;;  %1100 = vmatprep.subr.mxu1 %v911_v38  ;;  %v809_v51 = vadd.f32 %v808_v35, %v3034_v56  ;;  %v898_v5 = vadd.f32 %v897_v41, %v3034_v56  ;;  %v921_v10 = vmax.f32 %v805_v59, 0.0  ;;  %v923_v17 = vmax.f32 %v894_v7, 0.0  ;;  %v3149_v31 = vpop.permute.xlu1 %960 }
  0xf5   : > { %v810_v40 = vpop.f32.mrf.mxu0  ;;  %1012 = vmatpush1.msra.mxu0 %v908_v33  ;;  %v899_v43 = vpop.f32.mrf.mxu1  ;;  %1101 = vmatpush1.msra.mxu1 %v910_v39 }
  0xf6   : > { %2681 = vmatmul.mubr.msk.f32.vlgmr.msra.gmra.mxu0 %vm968_vm2, %v3067_v37  ;;  %2685 = vmatmul.mubr.msk.f32.vlgmr.msra.gmra.mxu1 %vm968_vm2, %v3067_v37  ;;  %v811_v49 = vadd.f32 %v810_v40, %v3034_v56  ;;  %v900_v61 = vadd.f32 %v899_v43, %v3034_v56  ;;  %v928_v1 = vmax.f32 %v809_v51, 0.0  ;;  %v920_v56 = vmax.f32 %v803_v62, 0.0  ;;  %v3154_v38 = vpop.permute.xlu0 %955 }
  0xf7   : > { %v814_v42 = vpop.f32.mrf.mxu0  ;;  %1051 = vmatprep.mubr.f32.mxu0 %v2825_v3  ;;  %v903_v47 = vpop.f32.mrf.mxu1  ;;  %1140 = vmatprep.mubr.f32.mxu1 %v2825_v3  ;;  %v930_v16 = vmax.f32 %v898_v5, 0.0 }
  0xf8   : > { %v815_v45 = vadd.f32 %v814_v42, %v3030_v48  ;;  %v904_v57 = vadd.f32 %v903_v47, %v3030_v48  ;;  %v929_v63 = vmax.f32 %v811_v49, 0.0  ;;  %v3157_v41 = vpop.permute.xlu1 %950 }
  0xf9   : > { %v816_v46 = vpop.f32.mrf.mxu0  ;;  %v905_v52 = vpop.f32.mrf.mxu1 }
  0xfa   : > { %v817_v50 = vadd.f32 %v816_v46, %v3030_v48  ;;  %2682 = vmatmul.mubr.msk.f32.gmra.mxu0 %vm968_vm2, %v3075_v44  ;;  %v906_v58 = vadd.f32 %v905_v52, %v3030_v48  ;;  %2686 = vmatmul.mubr.msk.f32.gmra.mxu1 %vm968_vm2, %v3075_v44  ;;  %v936_v60 = vmax.f32 %v815_v45, 0.0  ;;  %v799_v48 = vadd.f32 %v3050_v11, %v3043_v4 }
  0xfb   : > { %1057 = vmatprep.mubr.f32.mxu0 %v2825_v3  ;;  %1146 = vmatprep.mubr.f32.mxu1 %v2825_v3  ;;  %v938_v8 = vmax.f32 %v904_v57, 0.0  ;;  %v931_v11 = vmax.f32 %v900_v61, 0.0 }
  0xfc   : > { %v937_v55 = vmax.f32 %v817_v50, 0.0  ;;  %v939_v0 = vmax.f32 %v906_v58, 0.0  ;;  %v913_v14 = vmax.f32 %v799_v48, 0.0 }
  0xfe   : > { %2683 = vmatmul.mubr.msk.f32.gmra.mxu0 %vm968_vm2, %v3090_v54  ;;  %1183 = vmatprep.subr.mxu0 %v937_v55 }
  0xff   : > { %1184 = vmatpush1.msra.mxu0 %v936_v60  ;;  %1063 = vmatprep.mubr.f32.mxu0 %v2825_v3 }
 0x100   : > { %2687 = vmatmul.mubr.msk.f32.gmra.mxu1 %vm968_vm2, %v3090_v54  ;;  %1185 = vmatprep.subr.mxu0 %v929_v63 }
 0x101   : > { %1272 = vmatprep.subr.mxu1 %v939_v0  ;;  %1186 = vmatpush1.msra.mxu0 %v928_v1 }
 0x102   : > { %1273 = vmatpush1.msra.mxu1 %v938_v8  ;;  %2684 = vmatmul.mubr.msk.f32.gmra.mxu0 %vm968_vm2, %v943_v6 }
 0x103   : > { %1187 = vmatprep.subr.mxu0 %v921_v10  ;;  %1274 = vmatprep.subr.mxu1 %v931_v11 }
 0x104   : > { %1152 = vmatprep.mubr.f32.mxu1 %v2825_v3  ;;  %1188 = vmatpush1.msra.mxu0 %v920_v56 }
 0x105   : > { %1275 = vmatpush1.msra.mxu1 %v930_v16  ;;  %1189 = vmatprep.subr.mxu0 %v913_v14  ;;  %v3182_v14 = vld [vmem:[%s3461_s5] sm:$0xff] }
 0x106   : > { %2688 = vmatmul.mubr.msk.f32.gmra.mxu1 %vm968_vm2, %v943_v6  ;;  %1276 = vmatprep.subr.mxu1 %v923_v17 }
 0x107   : > { %1190 = vmatpush1.msra.mxu0 %v912_v18  ;;  %1223 = vmatprep.mubr.f32.mxu0 %v2825_v3 }
 0x108   : > { %1277 = vmatpush1.msra.mxu1 %v922_v53  ;;  %2689 = vmatmul.mubr.msk.f32.vlgmr.msra.gmra.mxu0 %vm968_vm2, %v3067_v37 }
 0x109   : > { %1278 = vmatprep.subr.mxu1 %v915_v19  ;;  %1312 = vmatprep.mubr.f32.mxu1 %v2825_v3 }
 0x10a   : > { %1279 = vmatpush1.msra.mxu1 %v914_v20  ;;  %1229 = vmatprep.mubr.f32.mxu0 %v2825_v3 }
 0x10b   : > { %2693 = vmatmul.mubr.msk.f32.vlgmr.msra.gmra.mxu1 %vm968_vm2, %v3067_v37 }
 0x10c   : > { %2690 = vmatmul.mubr.msk.f32.gmra.mxu0 %vm968_vm2, %v3075_v44  ;;  %1318 = vmatprep.mubr.f32.mxu1 %v2825_v3 }
 0x10d   : > { %1235 = vmatprep.mubr.f32.mxu0 %v2825_v3 }
 0x10f   : > { %2694 = vmatmul.mubr.msk.f32.gmra.mxu1 %vm968_vm2, %v3075_v44 }
 0x110   : > { %2691 = vmatmul.mubr.msk.f32.gmra.mxu0 %vm968_vm2, %v3090_v54  ;;  %1324 = vmatprep.mubr.f32.mxu1 %v2825_v3 }
 0x111   : > { %1241 = vmatprep.mubr.f32.mxu0 %v2825_v3 }
 0x113   : > { %2695 = vmatmul.mubr.msk.f32.gmra.mxu1 %vm968_vm2, %v3090_v54 }
 0x114   : > { %2692 = vmatmul.mubr.msk.f32.gmra.mxu0 %vm968_vm2, %v943_v6  ;;  %1330 = vmatprep.mubr.f32.mxu1 %v2825_v3 }
 0x115   : > { %1469 = vmatprep.mubr.f32.mxu0 %v2825_v3 }
 0x117   : > { %2696 = vmatmul.mubr.msk.f32.gmra.mxu1 %vm968_vm2, %v943_v6 }
 0x118   : > { %1558 = vmatprep.mubr.f32.mxu1 %v2825_v3 }
 0x1b6   : > { %v1047_v4 = vpop.f32.mrf.mxu0  ;;  %v1136_v21 = vpop.f32.mrf.mxu1 }
 0x1b7   : > { %v1048_v55 = vadd.f32 %v1047_v4, %v3157_v41  ;;  %v1137_v11 = vadd.f32 %v1136_v21, %v3157_v41  ;;  %v3190_v4 = vld [vmem:[%s3461_s5 + $0x8] sm:$0xff] }
 0x1b8   : > { %v1049_v12 = vpop.f32.mrf.mxu0  ;;  %v1138_v23 = vpop.f32.mrf.mxu1 }
 0x1b9   : > { %v1050_v50 = vadd.f32 %v1049_v12, %v3157_v41  ;;  %v1139_v7 = vadd.f32 %v1138_v23, %v3157_v41  ;;  %v1337_v10 = vmax.f32 %v1048_v55, 0.0  ;;  %v1339_v19 = vmax.f32 %v1137_v11, 0.0  ;;  %v3261_v11 = vpop.permute.xlu0 %1390 }
 0x1ba   : > { %v1053_v22 = vpop.f32.mrf.mxu0  ;;  %v1142_v25 = vpop.f32.mrf.mxu1 }
 0x1bb   : > { %v1054_v44 = vadd.f32 %v1053_v22, %v3154_v38  ;;  %v1143_v48 = vadd.f32 %v1142_v25, %v3154_v38  ;;  %v1338_v6 = vmax.f32 %v1050_v50, 0.0  ;;  %v1340_v18 = vmax.f32 %v1139_v7, 0.0  ;;  %v3202_v25 = vld [vmem:[%s3461_s5 + $0x10] sm:$0xff] }
 0x1bc   : > { %v1055_v24 = vpop.f32.mrf.mxu0  ;;  %v1144_v27 = vpop.f32.mrf.mxu1 }
 0x1bd   : > { %v1056_v42 = vadd.f32 %v1055_v24, %v3154_v38  ;;  %v1145_v61 = vadd.f32 %v1144_v27, %v3154_v38  ;;  %v1345_v0 = vmax.f32 %v1054_v44, 0.0  ;;  %v1347_v2 = vmax.f32 %v1143_v48, 0.0 }
 0x1be   : > { %v1059_v26 = vpop.f32.mrf.mxu0 }
 0x1bf   : > { %v1060_v39 = vadd.f32 %v1059_v26, %v3149_v31  ;;  %v1346_v60 = vmax.f32 %v1056_v42, 0.0  ;;  %v1348_v15 = vmax.f32 %v1145_v61, 0.0 }
 0x1c0   : > { %v1061_v29 = vpop.f32.mrf.mxu0  ;;  %v1148_v30 = vpop.f32.mrf.mxu1 }
 0x1c1   : > { %v1062_v36 = vadd.f32 %v1061_v29, %v3149_v31  ;;  %v1353_v57 = vmax.f32 %v1060_v39, 0.0  ;;  %v1149_v58 = vadd.f32 %v1148_v30, %v3149_v31 }
 0x1c2   : > { %v1065_v32 = vpop.f32.mrf.mxu0  ;;  %v1150_v33 = vpop.f32.mrf.mxu1 }
 0x1c3   : > { %v1066_v34 = vadd.f32 %v1065_v32, %v3147_v28  ;;  %v1354_v51 = vmax.f32 %v1062_v36, 0.0  ;;  %v1151_v52 = vadd.f32 %v1150_v33, %v3149_v31  ;;  %v1355_v56 = vmax.f32 %v1149_v58, 0.0 }
 0x1c4   : > { %v1067_v35 = vpop.f32.mrf.mxu0 }
 0x1c5   : > { %v1068_v37 = vadd.f32 %v1067_v35, %v3147_v28  ;;  %v1361_v45 = vmax.f32 %v1066_v34, 0.0  ;;  %v1356_v8 = vmax.f32 %v1151_v52, 0.0 }
 0x1c6   : > { %v1154_v40 = vpop.f32.mrf.mxu1 }
 0x1c7   : > { %v1362_v43 = vmax.f32 %v1068_v37, 0.0  ;;  %v1155_v46 = vadd.f32 %v1154_v40, %v3147_v28 }
 0x1c8   : > { %v1156_v47 = vpop.f32.mrf.mxu1  ;;  %v3162_v49 = vpop.f32.mrf.mxu0 }
 0x1c9   : > { %v1157_v54 = vadd.f32 %v1156_v47, %v3147_v28  ;;  %1429 = vmatprep.subr.mxu0 %v1362_v43  ;;  %v1363_v1 = vmax.f32 %v1155_v46, 0.0 }
 0x1ca   : > { %v3169_v59 = vpop.f32.mrf.mxu0  ;;  %1430 = vmatpush1.msra.mxu0 %v1361_v45 }
 0x1cb   : > { %v1364_v62 = vmax.f32 %v1157_v54, 0.0  ;;  %v3172_v63 = vpop.f32.mrf.mxu1  ;;  %1431 = vmatprep.subr.mxu0 %v1354_v51  ;;  %v1228_v43 = vadd.f32 %v3169_v59, %v3157_v41  ;;  %v1226_v51 = vadd.f32 %v3162_v49, %v3157_v41 }
 0x1cc   : > { %v1231_v5 = vpop.f32.mrf.mxu0  ;;  %1432 = vmatpush1.msra.mxu0 %v1353_v57  ;;  %v1315_v49 = vadd.f32 %v3172_v63, %v3157_v41 }
 0x1cd   : > { %v3176_v9 = vpop.f32.mrf.mxu1  ;;  %1518 = vmatprep.subr.mxu1 %v1364_v62  ;;  %1433 = vmatprep.subr.mxu0 %v1346_v60  ;;  %v1232_v40 = vadd.f32 %v1231_v5, %v3154_v38  ;;  %v1342_v57 = vmax.f32 %v1228_v43, 0.0  ;;  %v1341_v61 = vmax.f32 %v1226_v51, 0.0 }
 0x1ce   : > { %v1233_v13 = vpop.f32.mrf.mxu0  ;;  %1519 = vmatpush1.msra.mxu1 %v1363_v1  ;;  %1434 = vmatpush1.msra.mxu0 %v1345_v0  ;;  %v1317_v58 = vadd.f32 %v3176_v9, %v3157_v41  ;;  %v1343_v0 = vmax.f32 %v1315_v49, 0.0 }
 0x1cf   : > { %v1320_v16 = vpop.f32.mrf.mxu1  ;;  %1520 = vmatprep.subr.mxu1 %v1356_v8  ;;  %1435 = vmatprep.subr.mxu0 %v1338_v6  ;;  %v1234_v35 = vadd.f32 %v1233_v13, %v3154_v38  ;;  %v3263_v13 = vpop.permute.xlu1 %1385 }
 0x1d0   : > { %v1237_v17 = vpop.f32.mrf.mxu0  ;;  %1521 = vmatpush1.msra.mxu1 %v1355_v56  ;;  %1436 = vmatpush1.msra.mxu0 %v1337_v10  ;;  %v1321_v55 = vadd.f32 %v1320_v16, %v3154_v38  ;;  %v1344_v62 = vmax.f32 %v1317_v58, 0.0 }
 0x1d1   : > { %v1322_v53 = vpop.f32.mrf.mxu1  ;;  %1522 = vmatprep.subr.mxu1 %v1348_v15  ;;  %2697 = vmatmul.mubr.msk.f32.vlgmr.msra.gmra.mxu0 %vm968_vm2, %v3182_v14  ;;  %v1238_v30 = vadd.f32 %v1237_v17, %v3149_v31  ;;  %v1350_v52 = vmax.f32 %v1234_v35, 0.0 }
 0x1d2   : > { %v1239_v20 = vpop.f32.mrf.mxu0  ;;  %1523 = vmatpush1.msra.mxu1 %v1347_v2  ;;  %1475 = vmatprep.mubr.f32.mxu0 %v2825_v3  ;;  %v1323_v47 = vadd.f32 %v1322_v53, %v3154_v38  ;;  %v1351_v38 = vmax.f32 %v1321_v55, 0.0  ;;  %v3268_v53 = vpop.permute.xlu0 %1380 }
 0x1d3   : > { %v1326_v12 = vpop.f32.mrf.mxu1  ;;  %1524 = vmatprep.subr.mxu1 %v1340_v18  ;;  %v1240_v26 = vadd.f32 %v1239_v20, %v3149_v31  ;;  %v1357_v44 = vmax.f32 %v1238_v30, 0.0 }
 0x1d4   : > { %v1243_v21 = vpop.f32.mrf.mxu0  ;;  %1525 = vmatpush1.msra.mxu1 %v1339_v19  ;;  %v1327_v45 = vadd.f32 %v1326_v12, %v3149_v31  ;;  %v1352_v60 = vmax.f32 %v1323_v47, 0.0 }
 0x1d5   : > { %v1328_v22 = vpop.f32.mrf.mxu1  ;;  %2701 = vmatmul.mubr.msk.f32.vlgmr.msra.gmra.mxu1 %vm968_vm2, %v3182_v14  ;;  %2698 = vmatmul.mubr.msk.f32.gmra.mxu0 %vm968_vm2, %v3190_v4  ;;  %v1244_v23 = vadd.f32 %v1243_v21, %v3147_v28  ;;  %v1358_v42 = vmax.f32 %v1240_v26, 0.0 }
 0x1d6   : > { %v1245_v24 = vpop.f32.mrf.mxu0  ;;  %1564 = vmatprep.mubr.f32.mxu1 %v2825_v3  ;;  %1481 = vmatprep.mubr.f32.mxu0 %v2825_v3  ;;  %v1329_v37 = vadd.f32 %v1328_v22, %v3149_v31  ;;  %v1349_v31 = vmax.f32 %v1232_v40, 0.0  ;;  %v1359_v59 = vmax.f32 %v1327_v45, 0.0 }
 0x1d7   : > { %v1246_v27 = vadd.f32 %v1245_v24, %v3147_v28  ;;  %v1332_v29 = vpop.f32.mrf.mxu1  ;;  %v1365_v36 = vmax.f32 %v1244_v23, 0.0 }
 0x1d8   : > { %v1333_v33 = vadd.f32 %v1332_v29, %v3147_v28  ;;  %v1360_v54 = vmax.f32 %v1329_v37, 0.0 }
 0x1d9   : > { %v1366_v32 = vmax.f32 %v1246_v27, 0.0  ;;  %v1334_v34 = vpop.f32.mrf.mxu1  ;;  %2702 = vmatmul.mubr.msk.f32.gmra.mxu1 %vm968_vm2, %v3190_v4  ;;  %2699 = vmatmul.mubr.msk.f32.gmra.mxu0 %vm968_vm2, %v3202_v25 }
 0x1da   : > { %v1335_v39 = vadd.f32 %v1334_v34, %v3147_v28  ;;  %1570 = vmatprep.mubr.f32.mxu1 %v2825_v3  ;;  %1487 = vmatprep.mubr.f32.mxu0 %v2825_v3  ;;  %v1372_v28 = vld [vmem:[%s3461_s5 + $0x18] sm:$0xff]  ;;  %v1367_v50 = vmax.f32 %v1333_v33, 0.0 }
 0x1db   : > { %1607 = vmatprep.subr.mxu0 %v1366_v32 }
 0x1dc   : > { %v1368_v46 = vmax.f32 %v1335_v39, 0.0  ;;  %1608 = vmatpush1.msra.mxu0 %v1365_v36 }
 0x1dd   : > { %2703 = vmatmul.mubr.msk.f32.gmra.mxu1 %vm968_vm2, %v3202_v25  ;;  %1609 = vmatprep.subr.mxu0 %v1358_v42 }
 0x1de   : > { %1696 = vmatprep.subr.mxu1 %v1368_v46  ;;  %1610 = vmatpush1.msra.mxu0 %v1357_v44 }
 0x1df   : > { %1697 = vmatpush1.msra.mxu1 %v1367_v50  ;;  %2700 = vmatmul.mubr.msk.f32.gmra.mxu0 %vm968_vm2, %v1372_v28 }
 0x1e0   : > { %1611 = vmatprep.subr.mxu0 %v1350_v52  ;;  %1698 = vmatprep.subr.mxu1 %v1360_v54 }
 0x1e1   : > { %1576 = vmatprep.mubr.f32.mxu1 %v2825_v3  ;;  %1612 = vmatpush1.msra.mxu0 %v1349_v31 }
 0x1e2   : > { %1699 = vmatpush1.msra.mxu1 %v1359_v59  ;;  %1613 = vmatprep.subr.mxu0 %v1342_v57  ;;  %v3296_v57 = vld [vmem:[%s3462_s6] sm:$0xff] }
 0x1e3   : > { %2704 = vmatmul.mubr.msk.f32.gmra.mxu1 %vm968_vm2, %v1372_v28  ;;  %1700 = vmatprep.subr.mxu1 %v1352_v60 }
 0x1e4   : > { %1614 = vmatpush1.msra.mxu0 %v1341_v61  ;;  %1647 = vmatprep.mubr.f32.mxu0 %v2825_v3 }
 0x1e5   : > { %1701 = vmatpush1.msra.mxu1 %v1351_v38  ;;  %2705 = vmatmul.mubr.msk.f32.vlgmr.msra.gmra.mxu0 %vm968_vm2, %v3182_v14 }
 0x1e6   : > { %1702 = vmatprep.subr.mxu1 %v1344_v62  ;;  %1736 = vmatprep.mubr.f32.mxu1 %v2825_v3 }
 0x1e7   : > { %1703 = vmatpush1.msra.mxu1 %v1343_v0  ;;  %1653 = vmatprep.mubr.f32.mxu0 %v2825_v3 }
 0x1e8   : > { %2709 = vmatmul.mubr.msk.f32.vlgmr.msra.gmra.mxu1 %vm968_vm2, %v3182_v14 }
 0x1e9   : > { %2706 = vmatmul.mubr.msk.f32.gmra.mxu0 %vm968_vm2, %v3190_v4  ;;  %1742 = vmatprep.mubr.f32.mxu1 %v2825_v3 }
 0x1ea   : > { %1659 = vmatprep.mubr.f32.mxu0 %v2825_v3 }
 0x1ec   : > { %2710 = vmatmul.mubr.msk.f32.gmra.mxu1 %vm968_vm2, %v3190_v4  ;;  %v3271_v4 = vpop.permute.xlu1 %1375 }
 0x1ed   : > { %2707 = vmatmul.mubr.msk.f32.gmra.mxu0 %vm968_vm2, %v3202_v25  ;;  %1748 = vmatprep.mubr.f32.mxu1 %v2825_v3 }
 0x1ee   : > { %1665 = vmatprep.mubr.f32.mxu0 %v2825_v3 }
 0x1f0   : > { %2711 = vmatmul.mubr.msk.f32.gmra.mxu1 %vm968_vm2, %v3202_v25 }
 0x1f1   : > { %2708 = vmatmul.mubr.msk.f32.gmra.mxu0 %vm968_vm2, %v1372_v28  ;;  %1754 = vmatprep.mubr.f32.mxu1 %v2825_v3 }
 0x1f2   : > { %1897 = vmatprep.mubr.f32.mxu0 %v2825_v3 }
 0x1f4   : > { %2712 = vmatmul.mubr.msk.f32.gmra.mxu1 %vm968_vm2, %v1372_v28 }
 0x1f5   : > { %1986 = vmatprep.mubr.f32.mxu1 %v2825_v3 }
 0x291   : > { %v1471_v41 = vpop.f32.mrf.mxu0 }
 0x292   : > { %v1472_v33 = vadd.f32 %v1471_v41, %v3271_v4  ;;  %v3304_v41 = vld [vmem:[%s3462_s6 + $0x8] sm:$0xff] }
 0x293   : > { %v1473_v63 = vpop.f32.mrf.mxu0 }
 0x294   : > { %v1474_v27 = vadd.f32 %v1473_v63, %v3271_v4  ;;  %v1761_v52 = vmax.f32 %v1472_v33, 0.0 }
 0x295   : > { %v1560_v48 = vpop.f32.mrf.mxu1  ;;  %v1477_v1 = vpop.f32.mrf.mxu0 }
 0x296   : > { %v1478_v22 = vadd.f32 %v1477_v1, %v3268_v53  ;;  %v1762_v28 = vmax.f32 %v1474_v27, 0.0  ;;  %v1561_v54 = vadd.f32 %v1560_v48, %v3271_v4 }
 0x297   : > { %v1562_v5 = vpop.f32.mrf.mxu1  ;;  %v1479_v6 = vpop.f32.mrf.mxu0 }
 0x298   : > { %v1480_v12 = vadd.f32 %v1479_v6, %v3268_v53  ;;  %v1769_v43 = vmax.f32 %v1478_v22, 0.0  ;;  %v1563_v47 = vadd.f32 %v1562_v5, %v3271_v4  ;;  %v1763_v62 = vmax.f32 %v1561_v54, 0.0  ;;  %v3375_v54 = vpop.permute.xlu0 %1818 }
 0x299   : > { %v1566_v7 = vpop.f32.mrf.mxu1  ;;  %v1483_v8 = vpop.f32.mrf.mxu0 }
 0x29a   : > { %v1484_v19 = vadd.f32 %v1483_v8, %v3263_v13  ;;  %v1770_v37 = vmax.f32 %v1480_v12, 0.0  ;;  %v1567_v44 = vadd.f32 %v1566_v7, %v3268_v53  ;;  %v1764_v61 = vmax.f32 %v1563_v47, 0.0  ;;  %v3316_v7 = vld [vmem:[%s3462_s6 + $0x10] sm:$0xff] }
 0x29b   : > { %v1568_v9 = vpop.f32.mrf.mxu1  ;;  %v1485_v10 = vpop.f32.mrf.mxu0 }
 0x29c   : > { %v1486_v17 = vadd.f32 %v1485_v10, %v3263_v13  ;;  %v1777_v34 = vmax.f32 %v1484_v19, 0.0  ;;  %v1569_v39 = vadd.f32 %v1568_v9, %v3268_v53  ;;  %v1771_v49 = vmax.f32 %v1567_v44, 0.0 }
 0x29d   : > { %v1572_v56 = vpop.f32.mrf.mxu1 }
 0x29e   : > { %v1778_v29 = vmax.f32 %v1486_v17, 0.0  ;;  %v1573_v35 = vadd.f32 %v1572_v56, %v3263_v13  ;;  %v1772_v58 = vmax.f32 %v1569_v39, 0.0 }
 0x29f   : > { %v1489_v14 = vpop.f32.mrf.mxu0  ;;  %v1574_v15 = vpop.f32.mrf.mxu1 }
 0x2a0   : > { %v1490_v16 = vadd.f32 %v1489_v14, %v3261_v11  ;;  %v1575_v30 = vadd.f32 %v1574_v15, %v3263_v13  ;;  %v1779_v31 = vmax.f32 %v1573_v35, 0.0 }
 0x2a1   : > { %v1491_v2 = vpop.f32.mrf.mxu0 }
 0x2a2   : > { %v1492_v18 = vadd.f32 %v1491_v2, %v3261_v11  ;;  %v1785_v23 = vmax.f32 %v1490_v16, 0.0  ;;  %v1780_v50 = vmax.f32 %v1575_v30, 0.0 }
 0x2a3   : > { %v1578_v20 = vpop.f32.mrf.mxu1 }
 0x2a4   : > { %v1786_v21 = vmax.f32 %v1492_v18, 0.0  ;;  %v1579_v24 = vadd.f32 %v1578_v20, %v3261_v11 }
 0x2a5   : > { %v1580_v25 = vpop.f32.mrf.mxu1  ;;  %v3276_v26 = vpop.f32.mrf.mxu0 }
 0x2a6   : > { %v1581_v32 = vadd.f32 %v1580_v25, %v3261_v11  ;;  %1857 = vmatprep.subr.mxu0 %v1786_v21  ;;  %v1787_v45 = vmax.f32 %v1579_v24, 0.0 }
 0x2a7   : > { %v3283_v36 = vpop.f32.mrf.mxu0  ;;  %1858 = vmatpush1.msra.mxu0 %v1785_v23 }
 0x2a8   : > { %v1788_v40 = vmax.f32 %v1581_v32, 0.0  ;;  %v3286_v42 = vpop.f32.mrf.mxu1  ;;  %1859 = vmatprep.subr.mxu0 %v1778_v29  ;;  %v1652_v21 = vadd.f32 %v3283_v36, %v3271_v4  ;;  %v1650_v29 = vadd.f32 %v3276_v26, %v3271_v4 }
 0x2a9   : > { %v1655_v46 = vpop.f32.mrf.mxu0  ;;  %1860 = vmatpush1.msra.mxu0 %v1777_v34  ;;  %v1739_v26 = vadd.f32 %v3286_v42, %v3271_v4 }
 0x2aa   : > { %v3290_v51 = vpop.f32.mrf.mxu1  ;;  %1946 = vmatprep.subr.mxu1 %v1788_v40  ;;  %1861 = vmatprep.subr.mxu0 %v1770_v37  ;;  %v1656_v20 = vadd.f32 %v1655_v46, %v3268_v53  ;;  %v1766_v34 = vmax.f32 %v1652_v21, 0.0  ;;  %v1765_v39 = vmax.f32 %v1650_v29, 0.0 }
 0x2ab   : > { %v1657_v55 = vpop.f32.mrf.mxu0  ;;  %1947 = vmatpush1.msra.mxu1 %v1787_v45  ;;  %1862 = vmatpush1.msra.mxu0 %v1769_v43  ;;  %v1741_v35 = vadd.f32 %v3290_v51, %v3271_v4  ;;  %v1767_v43 = vmax.f32 %v1739_v26, 0.0 }
 0x2ac   : > { %v1744_v59 = vpop.f32.mrf.mxu1  ;;  %1948 = vmatprep.subr.mxu1 %v1780_v50  ;;  %1863 = vmatprep.subr.mxu0 %v1762_v28  ;;  %v1658_v2 = vadd.f32 %v1657_v55, %v3268_v53  ;;  %v3377_v55 = vpop.permute.xlu1 %1813 }
 0x2ad   : > { %v1661_v60 = vpop.f32.mrf.mxu0  ;;  %1949 = vmatpush1.msra.mxu1 %v1779_v31  ;;  %1864 = vmatpush1.msra.mxu0 %v1761_v52  ;;  %v1745_v33 = vadd.f32 %v1744_v59, %v3268_v53  ;;  %v1768_v40 = vmax.f32 %v1741_v35, 0.0 }
 0x2ae   : > { %v1746_v38 = vpop.f32.mrf.mxu1  ;;  %1950 = vmatprep.subr.mxu1 %v1772_v58  ;;  %2713 = vmatmul.mubr.msk.f32.vlgmr.msra.gmra.mxu0 %vm968_vm2, %v3296_v57  ;;  %v1662_v56 = vadd.f32 %v1661_v60, %v3263_v13  ;;  %v1774_v30 = vmax.f32 %v1658_v2, 0.0 }
 0x2af   : > { %v1663_v0 = vpop.f32.mrf.mxu0  ;;  %1951 = vmatpush1.msra.mxu1 %v1771_v49  ;;  %1903 = vmatprep.mubr.f32.mxu0 %v2825_v3  ;;  %v1747_v25 = vadd.f32 %v1746_v38, %v3268_v53  ;;  %v1775_v53 = vmax.f32 %v1745_v33, 0.0  ;;  %v3382_v38 = vpop.permute.xlu0 %1808 }
 0x2b0   : > { %v1750_v63 = vpop.f32.mrf.mxu1  ;;  %1952 = vmatprep.subr.mxu1 %v1764_v61  ;;  %v1664_v8 = vadd.f32 %v1663_v0, %v3263_v13  ;;  %v1781_v22 = vmax.f32 %v1662_v56, 0.0 }
 0x2b1   : > { %v1667_v48 = vpop.f32.mrf.mxu0  ;;  %1953 = vmatpush1.msra.mxu1 %v1763_v62  ;;  %v1751_v23 = vadd.f32 %v1750_v63, %v3263_v13  ;;  %v1776_v37 = vmax.f32 %v1747_v25, 0.0 }
 0x2b2   : > { %v1752_v1 = vpop.f32.mrf.mxu1  ;;  %2717 = vmatmul.mubr.msk.f32.vlgmr.msra.gmra.mxu1 %vm968_vm2, %v3296_v57  ;;  %2714 = vmatmul.mubr.msk.f32.gmra.mxu0 %vm968_vm2, %v3304_v41  ;;  %v1668_v5 = vadd.f32 %v1667_v48, %v3261_v11  ;;  %v1782_v12 = vmax.f32 %v1664_v8, 0.0 }
 0x2b3   : > { %v1669_v6 = vpop.f32.mrf.mxu0  ;;  %1992 = vmatprep.mubr.f32.mxu1 %v2825_v3  ;;  %1909 = vmatprep.mubr.f32.mxu0 %v2825_v3  ;;  %v1753_v18 = vadd.f32 %v1752_v1, %v3263_v13  ;;  %v1773_v13 = vmax.f32 %v1656_v20, 0.0  ;;  %v1783_v36 = vmax.f32 %v1751_v23, 0.0 }
 0x2b4   : > { %v1670_v9 = vadd.f32 %v1669_v6, %v3261_v11  ;;  %v1756_v10 = vpop.f32.mrf.mxu1  ;;  %v1789_v17 = vmax.f32 %v1668_v5, 0.0 }
 0x2b5   : > { %v1757_v15 = vadd.f32 %v1756_v10, %v3261_v11  ;;  %v1784_v32 = vmax.f32 %v1753_v18, 0.0 }
 0x2b6   : > { %v1790_v14 = vmax.f32 %v1670_v9, 0.0  ;;  %v1758_v16 = vpop.f32.mrf.mxu1  ;;  %2718 = vmatmul.mubr.msk.f32.gmra.mxu1 %vm968_vm2, %v3304_v41  ;;  %2715 = vmatmul.mubr.msk.f32.gmra.mxu0 %vm968_vm2, %v3316_v7 }
 0x2b7   : > { %v1759_v19 = vadd.f32 %v1758_v16, %v3261_v11  ;;  %1998 = vmatprep.mubr.f32.mxu1 %v2825_v3  ;;  %1915 = vmatprep.mubr.f32.mxu0 %v2825_v3  ;;  %v1796_v11 = vld [vmem:[%s3462_s6 + $0x18] sm:$0xff]  ;;  %v1791_v27 = vmax.f32 %v1757_v15, 0.0 }
 0x2b8   : > { %2035 = vmatprep.subr.mxu0 %v1790_v14 }
 0x2b9   : > { %v1792_v24 = vmax.f32 %v1759_v19, 0.0  ;;  %2036 = vmatpush1.msra.mxu0 %v1789_v17 }
 0x2ba   : > { %2719 = vmatmul.mubr.msk.f32.gmra.mxu1 %vm968_vm2, %v3316_v7  ;;  %2037 = vmatprep.subr.mxu0 %v1782_v12 }
 0x2bb   : > { %2124 = vmatprep.subr.mxu1 %v1792_v24  ;;  %2038 = vmatpush1.msra.mxu0 %v1781_v22 }
 0x2bc   : > { %2125 = vmatpush1.msra.mxu1 %v1791_v27  ;;  %2716 = vmatmul.mubr.msk.f32.gmra.mxu0 %vm968_vm2, %v1796_v11 }
 0x2bd   : > { %2039 = vmatprep.subr.mxu0 %v1774_v30  ;;  %2126 = vmatprep.subr.mxu1 %v1784_v32 }
 0x2be   : > { %2004 = vmatprep.mubr.f32.mxu1 %v2825_v3  ;;  %2040 = vmatpush1.msra.mxu0 %v1773_v13 }
 0x2bf   : > { %2127 = vmatpush1.msra.mxu1 %v1783_v36  ;;  %2041 = vmatprep.subr.mxu0 %v1766_v34  ;;  %v3406_v34 = vld [vmem:[%s3463_s7] sm:$0x7] }
 0x2c0   : > { %2720 = vmatmul.mubr.msk.f32.gmra.mxu1 %vm968_vm2, %v1796_v11  ;;  %2128 = vmatprep.subr.mxu1 %v1776_v37 }
 0x2c1   : > { %2042 = vmatpush1.msra.mxu0 %v1765_v39  ;;  %2075 = vmatprep.mubr.f32.mxu0 %v2825_v3 }
 0x2c2   : > { %2129 = vmatpush1.msra.mxu1 %v1775_v53  ;;  %2721 = vmatmul.mubr.msk.f32.vlgmr.msra.gmra.mxu0 %vm968_vm2, %v3296_v57 }
 0x2c3   : > { %2130 = vmatprep.subr.mxu1 %v1768_v40  ;;  %2164 = vmatprep.mubr.f32.mxu1 %v2825_v3 }
 0x2c4   : > { %2131 = vmatpush1.msra.mxu1 %v1767_v43  ;;  %2081 = vmatprep.mubr.f32.mxu0 %v2825_v3 }
 0x2c5   : > { %2725 = vmatmul.mubr.msk.f32.vlgmr.msra.gmra.mxu1 %vm968_vm2, %v3296_v57 }
 0x2c6   : > { %2722 = vmatmul.mubr.msk.f32.gmra.mxu0 %vm968_vm2, %v3304_v41  ;;  %2170 = vmatprep.mubr.f32.mxu1 %v2825_v3 }
 0x2c7   : > { %2087 = vmatprep.mubr.f32.mxu0 %v2825_v3 }
 0x2c9   : > { %2726 = vmatmul.mubr.msk.f32.gmra.mxu1 %vm968_vm2, %v3304_v41  ;;  %v3385_v41 = vpop.permute.xlu1 %1803 }
 0x2ca   : > { %2723 = vmatmul.mubr.msk.f32.gmra.mxu0 %vm968_vm2, %v3316_v7  ;;  %2176 = vmatprep.mubr.f32.mxu1 %v2825_v3 }
 0x2cb   : > { %2093 = vmatprep.mubr.f32.mxu0 %v2825_v3 }
 0x2cd   : > { %2727 = vmatmul.mubr.msk.f32.gmra.mxu1 %vm968_vm2, %v3316_v7 }
 0x2ce   : > { %2724 = vmatmul.mubr.msk.f32.gmra.mxu0 %vm968_vm2, %v1796_v11  ;;  %2182 = vmatprep.mubr.f32.mxu1 %v2825_v3 }
 0x2cf   : > { %2295 = vmatprep.mubr.f32.mxu0 %v2825_v3 }
 0x2d1   : > { %2728 = vmatmul.mubr.msk.f32.gmra.mxu1 %vm968_vm2, %v1796_v11 }
 0x2d2   : > { %2366 = vmatprep.mubr.f32.mxu1 %v2825_v3 }
 0x36e   : > { %v1899_v4 = vpop.f32.mrf.mxu0 }
 0x36f   : > { %v1900_v15 = vadd.f32 %v1899_v4, %v3385_v41 }
 0x370   : > { %v1901_v42 = vpop.f32.mrf.mxu0 }
 0x371   : > { %v1902_v9 = vadd.f32 %v1901_v42, %v3385_v41  ;;  %v2189_v30 = vmax.f32 %v1900_v15, 0.0 }
 0x372   : > { %v1988_v44 = vpop.f32.mrf.mxu1  ;;  %v1905_v45 = vpop.f32.mrf.mxu0 }
 0x373   : > { %v1906_v1 = vadd.f32 %v1905_v45, %v3382_v38  ;;  %v2190_v11 = vmax.f32 %v1902_v9, 0.0  ;;  %v1989_v32 = vadd.f32 %v1988_v44, %v3385_v41 }
 0x374   : > { %v1990_v46 = vpop.f32.mrf.mxu1  ;;  %v1907_v28 = vpop.f32.mrf.mxu0 }
 0x375   : > { %v1908_v63 = vadd.f32 %v1907_v28, %v3382_v38  ;;  %v2197_v21 = vmax.f32 %v1906_v1, 0.0  ;;  %v1991_v25 = vadd.f32 %v1990_v46, %v3385_v41  ;;  %v2191_v40 = vmax.f32 %v1989_v32, 0.0 }
 0x376   : > { %v1994_v47 = vpop.f32.mrf.mxu1  ;;  %v1911_v50 = vpop.f32.mrf.mxu0 }
 0x377   : > { %v1912_v62 = vadd.f32 %v1911_v50, %v3377_v55  ;;  %v2198_v18 = vmax.f32 %v1908_v63, 0.0  ;;  %v1995_v22 = vadd.f32 %v1994_v47, %v3382_v38  ;;  %v2192_v39 = vmax.f32 %v1991_v25, 0.0 }
 0x378   : > { %v1996_v51 = vpop.f32.mrf.mxu1  ;;  %v1913_v52 = vpop.f32.mrf.mxu0 }
 0x379   : > { %v1914_v60 = vadd.f32 %v1913_v52, %v3377_v55  ;;  %v2205_v16 = vmax.f32 %v1912_v62, 0.0  ;;  %v1997_v19 = vadd.f32 %v1996_v51, %v3382_v38  ;;  %v2199_v26 = vmax.f32 %v1995_v22, 0.0 }
 0x37a   : > { %v2000_v31 = vpop.f32.mrf.mxu1 }
 0x37b   : > { %v2206_v10 = vmax.f32 %v1914_v60, 0.0  ;;  %v2001_v2 = vadd.f32 %v2000_v31, %v3377_v55  ;;  %v2200_v35 = vmax.f32 %v1997_v19, 0.0 }
 0x37c   : > { %v1917_v57 = vpop.f32.mrf.mxu0  ;;  %v2002_v58 = vpop.f32.mrf.mxu1 }
 0x37d   : > { %v1918_v59 = vadd.f32 %v1917_v57, %v3375_v54  ;;  %v2003_v56 = vadd.f32 %v2002_v58, %v3377_v55  ;;  %v2207_v13 = vmax.f32 %v2001_v2, 0.0 }
 0x37e   : > { %v1919_v49 = vpop.f32.mrf.mxu0 }
 0x37f   : > { %v1920_v61 = vadd.f32 %v1919_v49, %v3375_v54  ;;  %v2213_v5 = vmax.f32 %v1918_v59, 0.0  ;;  %v2208_v27 = vmax.f32 %v2003_v56, 0.0 }
 0x380   : > { %v2006_v0 = vpop.f32.mrf.mxu1 }
 0x381   : > { %v2214_v48 = vmax.f32 %v1920_v61, 0.0  ;;  %v2007_v6 = vadd.f32 %v2006_v0, %v3375_v54 }
 0x382   : > { %v2008_v7 = vpop.f32.mrf.mxu1  ;;  %v3390_v8 = vpop.f32.mrf.mxu0 }
 0x383   : > { %v2009_v14 = vadd.f32 %v2008_v7, %v3375_v54  ;;  %2255 = vmatprep.subr.mxu0 %v2214_v48  ;;  %v2215_v23 = vmax.f32 %v2007_v6, 0.0  ;;  %v2078_v63 = vadd.f32 %v3390_v8, %v3385_v41 }
 0x384   : > { %v2079_v17 = vpop.f32.mrf.mxu0  ;;  %2256 = vmatpush1.msra.mxu0 %v2213_v5 }
 0x385   : > { %v2216_v20 = vmax.f32 %v2009_v14, 0.0  ;;  %v3398_v12 = vpop.f32.mrf.mxu1  ;;  %2257 = vmatprep.subr.mxu0 %v2206_v10  ;;  %v2080_v61 = vadd.f32 %v2079_v17, %v3385_v41  ;;  %v2193_v15 = vmax.f32 %v2078_v63, 0.0 }
 0x386   : > { %v2083_v24 = vpop.f32.mrf.mxu0  ;;  %2258 = vmatpush1.msra.mxu0 %v2205_v16  ;;  %v2167_v8 = vadd.f32 %v3398_v12, %v3385_v41 }
 0x387   : > { %v2168_v29 = vpop.f32.mrf.mxu1  ;;  %2326 = vmatprep.subr.mxu1 %v2216_v20  ;;  %2259 = vmatprep.subr.mxu0 %v2198_v18  ;;  %v2084_v59 = vadd.f32 %v2083_v24, %v3382_v38  ;;  %v2226_v18 = vpop.permute.xlu0 %2225 }
 0x388   : > { %v2085_v33 = vpop.f32.mrf.mxu0  ;;  %2327 = vmatpush1.msra.mxu1 %v2215_v23  ;;  %2260 = vmatpush1.msra.mxu0 %v2197_v21  ;;  %v2169_v10 = vadd.f32 %v2168_v29, %v3385_v41  ;;  %v2195_v17 = vmax.f32 %v2167_v8, 0.0 }
 0x389   : > { %v2172_v36 = vpop.f32.mrf.mxu1  ;;  %2328 = vmatprep.subr.mxu1 %v2208_v27  ;;  %2261 = vmatprep.subr.mxu0 %v2190_v11  ;;  %v2086_v52 = vadd.f32 %v2085_v33, %v3382_v38 }
 0x38a   : > { %v2089_v37 = vpop.f32.mrf.mxu0  ;;  %2329 = vmatpush1.msra.mxu1 %v2207_v13  ;;  %2262 = vmatpush1.msra.mxu0 %v2189_v30  ;;  %v2173_v7 = vadd.f32 %v2172_v36, %v3382_v38  ;;  %v2196_v2 = vmax.f32 %v2169_v10, 0.0 }
 0x38b   : > { %v2174_v53 = vpop.f32.mrf.mxu1  ;;  %2330 = vmatprep.subr.mxu1 %v2200_v35  ;;  %2729 = vmatmul.mubr.msk.f32.vlgmr.msra.gmra.mxu0 %vm968_vm2, %v3406_v34  ;;  %v2090_v51 = vadd.f32 %v2089_v37, %v3377_v55  ;;  %v2202_v6 = vmax.f32 %v2086_v52, 0.0 }
 0x38c   : > { %v2091_v43 = vpop.f32.mrf.mxu0  ;;  %2331 = vmatpush1.msra.mxu1 %v2199_v26  ;;  %2437 = vmatprep.mubr.f32.mxu0 %v2825_v3  ;;  %v2175_v1 = vadd.f32 %v2174_v53, %v3382_v38  ;;  %v2203_v38 = vmax.f32 %v2173_v7, 0.0 }
 0x38d   : > { %v2178_v4 = vpop.f32.mrf.mxu1  ;;  %2332 = vmatprep.subr.mxu1 %v2192_v39  ;;  %v2092_v28 = vadd.f32 %v2091_v43, %v3377_v55  ;;  %v2209_v48 = vmax.f32 %v2090_v51, 0.0 }
 0x38e   : > { %v2095_v42 = vpop.f32.mrf.mxu0  ;;  %2333 = vmatpush1.msra.mxu1 %v2191_v40  ;;  %v2179_v0 = vadd.f32 %v2178_v4, %v3377_v55  ;;  %v2204_v16 = vmax.f32 %v2175_v1, 0.0 }
 0x38f   : > { %v2180_v44 = vpop.f32.mrf.mxu1  ;;  %2730 = vmatmul.mubr.msk.f32.vlgmr.msra.gmra.mxu1 %vm968_vm2, %v3406_v34  ;;  %v2096_v45 = vadd.f32 %v2095_v42, %v3375_v54  ;;  %v2210_v62 = vmax.f32 %v2092_v28, 0.0 }
 0x390   : > { %v2097_v46 = vpop.f32.mrf.mxu0  ;;  %2508 = vmatprep.mubr.f32.mxu1 %v2825_v3  ;;  %v2181_v60 = vadd.f32 %v2180_v44, %v3377_v55  ;;  %v2194_v55 = vmax.f32 %v2080_v61, 0.0  ;;  %v2211_v14 = vmax.f32 %v2179_v0, 0.0 }
 0x391   : > { %v2098_v47 = vadd.f32 %v2097_v46, %v3375_v54  ;;  %v2184_v50 = vpop.f32.mrf.mxu1  ;;  %v2217_v49 = vmax.f32 %v2096_v45, 0.0 }
 0x392   : > { %v2185_v57 = vadd.f32 %v2184_v50, %v3375_v54  ;;  %v2212_v56 = vmax.f32 %v2181_v60, 0.0 }
 0x393   : > { %v2218_v31 = vmax.f32 %v2098_v47, 0.0  ;;  %v2186_v58 = vpop.f32.mrf.mxu1 }
 0x394   : > { %v2187_v3 = vadd.f32 %v2186_v58, %v3375_v54  ;;  %v2219_v9 = vmax.f32 %v2185_v57, 0.0  ;;  %v2201_v54 = vmax.f32 %v2084_v59, 0.0 }
 0x395   : > { %2397 = vmatprep.subr.mxu0 %v2218_v31 }
 0x396   : > { %v2220_v5 = vmax.f32 %v2187_v3, 0.0  ;;  %2398 = vmatpush1.msra.mxu0 %v2217_v49 }
 0x397   : > { %2399 = vmatprep.subr.mxu0 %v2210_v62 }
 0x398   : > { %2468 = vmatprep.subr.mxu1 %v2220_v5  ;;  %2400 = vmatpush1.msra.mxu0 %v2209_v48 }
 0x399   : > { %2469 = vmatpush1.msra.mxu1 %v2219_v9  ;;  %2401 = vmatprep.subr.mxu0 %v2202_v6 }
 0x39a   : > { %2470 = vmatprep.subr.mxu1 %v2212_v56  ;;  %2402 = vmatpush1.msra.mxu0 %v2201_v54 }
 0x39b   : > { %2471 = vmatpush1.msra.mxu1 %v2211_v14  ;;  %2403 = vmatprep.subr.mxu0 %v2194_v55 }
 0x39c   : > { %2472 = vmatprep.subr.mxu1 %v2204_v16  ;;  %2404 = vmatpush1.msra.mxu0 %v2193_v15 }
 0x39d   : > { %2473 = vmatpush1.msra.mxu1 %v2203_v38  ;;  %2731 = vmatmul.mubr.msk.f32.vlgmr.msra.gmra.mxu0 %vm968_vm2, %v3406_v34 }
 0x39e   : > { %2474 = vmatprep.subr.mxu1 %v2196_v2 }
 0x39f   : > { %2475 = vmatpush1.msra.mxu1 %v2195_v17 }
 0x3a0   : > { %2732 = vmatmul.mubr.msk.f32.vlgmr.msra.gmra.mxu1 %vm968_vm2, %v3406_v34 }
 0x44b   : > { %v2297_v41 = vpop.f32.mrf.mxu0 }
 0x44c   : > { %v2298_v20 = vadd.f32 %v2297_v41, %v2226_v18 }
 0x44d   : > { %v2299_v19 = vpop.f32.mrf.mxu0 }
 0x44e   : > { %v2300_v12 = vadd.f32 %v2299_v19, %v2226_v18 }
 0x44f   : > { %v2368_v21 = vpop.f32.mrf.mxu1 }
 0x450   : > { %v2523_v22 = vcombine.low %v2298_v20, %v2300_v12  ;;  %v2369_v24 = vadd.f32 %v2368_v21, %v2226_v18 }
 0x451   : > { %v2370_v23 = vpop.f32.mrf.mxu1 }
 0x452   : > { %2531 = vst [vmem:[%s450_s16] sm:$0x77] %v2523_v22  ;;  %v2371_v11 = vadd.f32 %v2370_v23, %v2226_v18 }
 0x454   : > { %v2524_v25 = vcombine.low %v2369_v24, %v2371_v11 }
 0x456   : > { %2532 = vst [vmem:[%s450_s16 + $0x8] sm:$0x77] %v2524_v25 }
 0x45d   : > { %v2439_v27 = vpop.f32.mrf.mxu0 }
 0x45e   : > { %v2440_v30 = vadd.f32 %v2439_v27, %v2226_v18 }
 0x45f   : > { %v2441_v29 = vpop.f32.mrf.mxu0 }
 0x460   : > { %v2442_v32 = vadd.f32 %v2441_v29, %v2226_v18  ;;  %v2510_v13 = vpop.f32.mrf.mxu1 }
 0x461   : > { %v2511_v35 = vadd.f32 %v2510_v13, %v2226_v18 }
 0x462   : > { %v2525_v33 = vcombine.low %v2440_v30, %v2442_v32  ;;  %v2512_v34 = vpop.f32.mrf.mxu1 }
 0x463   : > { %v2513_v36 = vadd.f32 %v2512_v34, %v2226_v18 }
 0x464   : > { %2533 = vst [vmem:[%s450_s16 + $0x10] sm:$0x77] %v2525_v33 }
 0x465   : > { %v2526_v26 = vcombine.low %v2511_v35, %v2513_v36 }
 0x467   : > { %2534 = vst [vmem:[%s450_s16 + $0x18] sm:$0x77] %v2526_v26 }
 0x468 PF: > { %s21_s21 = sadd.s32 1, %s2822_s21   ;;  %s3468_s17 = smov %s2814_s19 }
 0x469   : > { %p18_p7 = scmp.ge.s32.totalorder %s21_s21, 6   ;;  %s3469_s18 = smov %s2818_s20 }
 0x46a   : > { %s3470_s19 = smov %s3473_s22  ;;  %s3471_s20 = smov %s3477_s23 }
 0x46b   :  { %20 = sbr.rel (!%p18_p7) target bundleno = 3 (0x3), region = 100 }

</bundles_post_ra>
